<compile_context>
chip_gen: v5e
topology: v5e:2x2
jax: 0.10.0
libtpu: 0.0.40
codegen_flags: <defaults>
</compile_context>

<pallas_src>
import math

import jax
import jax.numpy as jnp
from jax.experimental import pallas as pl
from jax.experimental.pallas import tpu as pltpu

# ---------------- model hyper-parameters (small, deterministic) --------------
B = 2            # batch
S = 8            # src seq len
T = 8            # trg seq len
HID = 32         # hidden dim
NH = 4           # heads
DH = HID // NH   # head dim
PF = 64          # feed-forward dim
SRC_VOCAB = 20
TRG_VOCAB = 20
SRC_PAD_IDX = 0
TRG_PAD_IDX = 0
N_LAYERS = 1     # fused kernel below is specialized for 1 encoder + 1 decoder layer

_NEG = -1e10


# ------------------------------ fused Pallas kernel ---------------------------
def _ln(x, g, b):
    mu = jnp.mean(x, axis=-1, keepdims=True)
    var = jnp.mean((x - mu) ** 2, axis=-1, keepdims=True)
    return (x - mu) * jax.lax.rsqrt(var + 1e-5) * g + b


def _mha(q, k, v, bias, scale, attn_ref=None):
    """q: [Lq, HID], k/v: [Lk, HID], bias broadcastable to [Lq, Lk] (additive, 0/-1e10).

    Heads are processed with static lane slices; the concatenated-head output keeps
    HID as the (lane-dense) last axis. If attn_ref is given, normalized attention
    probabilities are written to attn_ref[0, h]."""
    outs = []
    for h in range(NH):
        lo = h * DH
        qh = q[:, lo:lo + DH]
        kh = k[:, lo:lo + DH]
        vh = v[:, lo:lo + DH]
        energy = jax.lax.dot_general(
            qh, kh, (((1,), (1,)), ((), ())),
            preferred_element_type=jnp.float32) * scale + bias
        emax = jnp.max(energy, axis=-1, keepdims=True)
        p = jnp.exp(energy - emax)
        attn = p / jnp.sum(p, axis=-1, keepdims=True)
        if attn_ref is not None:
            attn_ref[0, h, :, :] = attn
        outs.append(jnp.dot(attn, vh, preferred_element_type=jnp.float32))
    return jnp.concatenate(outs, axis=-1)


def _seq2seq_kernel(
    # per-batch activations / mask biases
    src_emb_ref, trg_emb_ref, src_bias_ref, trg_bias_ref,
    # encoder layer
    e_wqkv, e_bqkv, e_wo, e_bo, e_ln1g, e_ln1b,
    e_w1, e_b1, e_w2, e_b2, e_ln2g, e_ln2b,
    # decoder layer: self-attention
    d_wqkv, d_bqkv, d_wo, d_bo, d_ln1g, d_ln1b,
    # decoder layer: cross-attention
    d_wq, d_bq, d_wkv, d_bkv, d_woc, d_boc, d_ln2g, d_ln2b,
    # decoder layer: feed-forward
    d_w1, d_b1, d_w2, d_b2, d_ln3g, d_ln3b,
    # output projection
    fc_w, fc_b,
    # outputs
    out_ref, attn_ref,
):
    scale = 1.0 / math.sqrt(DH)

    # ------------------------------- encoder (1 layer) ------------------------
    x = src_emb_ref[0]                      # [S, HID]
    src_bias = src_bias_ref[0]              # [1, S]
    qkv = jnp.dot(x, e_wqkv[...], preferred_element_type=jnp.float32) + e_bqkv[...]
    a = _mha(qkv[:, :HID], qkv[:, HID:2 * HID], qkv[:, 2 * HID:], src_bias, scale)
    a = jnp.dot(a, e_wo[...], preferred_element_type=jnp.float32) + e_bo[...]
    x = _ln(x + a, e_ln1g[...], e_ln1b[...])
    h = jnp.maximum(
        jnp.dot(x, e_w1[...], preferred_element_type=jnp.float32) + e_b1[...], 0.0)
    h = jnp.dot(h, e_w2[...], preferred_element_type=jnp.float32) + e_b2[...]
    enc = _ln(x + h, e_ln2g[...], e_ln2b[...])          # [S, HID]

    # ------------------------------- decoder (1 layer) ------------------------
    y = trg_emb_ref[0]                      # [T, HID]
    trg_bias = trg_bias_ref[0]              # [T, T]

    # masked self-attention
    qkv = jnp.dot(y, d_wqkv[...], preferred_element_type=jnp.float32) + d_bqkv[...]
    a = _mha(qkv[:, :HID], qkv[:, HID:2 * HID], qkv[:, 2 * HID:], trg_bias, scale)
    a = jnp.dot(a, d_wo[...], preferred_element_type=jnp.float32) + d_bo[...]
    y = _ln(y + a, d_ln1g[...], d_ln1b[...])

    # encoder-decoder cross-attention (this is the attention that gets returned)
    q = jnp.dot(y, d_wq[...], preferred_element_type=jnp.float32) + d_bq[...]
    kv = jnp.dot(enc, d_wkv[...], preferred_element_type=jnp.float32) + d_bkv[...]
    a = _mha(q, kv[:, :HID], kv[:, HID:], src_bias, scale, attn_ref=attn_ref)
    a = jnp.dot(a, d_woc[...], preferred_element_type=jnp.float32) + d_boc[...]
    y = _ln(y + a, d_ln2g[...], d_ln2b[...])

    # position-wise feed-forward
    h = jnp.maximum(
        jnp.dot(y, d_w1[...], preferred_element_type=jnp.float32) + d_b1[...], 0.0)
    h = jnp.dot(h, d_w2[...], preferred_element_type=jnp.float32) + d_b2[...]
    y = _ln(y + h, d_ln3g[...], d_ln3b[...])

    # vocab projection
    out_ref[0] = jnp.dot(y, fc_w[...], preferred_element_type=jnp.float32) + fc_b[...]


# ------------------------------ pallas_call wrapper ----------------------------
def _bspec(shape):
    """Per-batch block: (1, *rest), indexed by the batch grid axis."""
    nd = len(shape)
    return pl.BlockSpec((1,) + tuple(shape[1:]),
                        lambda b, _n=nd: (b,) + (0,) * (_n - 1))


def _wspec(shape):
    """Shared (weight) block: full array, same for every grid step."""
    nd = len(shape)
    return pl.BlockSpec(tuple(shape), lambda b, _n=nd: (0,) * _n)


def seq2seq_forward(params, src, trg):
    enc_p, dec_p = params["encoder"], params["decoder"]
    Bn, Sn = src.shape
    Tn = trg.shape[1]
    emb_scale = math.sqrt(HID)

    # Embedding lookup + additive mask biases in plain JAX (cheap, XLA-fused glue).
    src_emb = jnp.take(enc_p["tok_emb"], src, axis=0) * emb_scale + enc_p["pos_emb"][:Sn][None]
    trg_emb = jnp.take(dec_p["tok_emb"], trg, axis=0) * emb_scale + dec_p["pos_emb"][:Tn][None]
    src_bias = jnp.where(src != SRC_PAD_IDX, 0.0, _NEG).astype(jnp.float32)[:, None, :]   # [B,1,S]
    causal = jnp.tril(jnp.ones((Tn, Tn), dtype=jnp.bool_))
    keep = (trg != TRG_PAD_IDX)[:, None, :] & causal[None, :, :]
    trg_bias = jnp.where(keep, 0.0, _NEG).astype(jnp.float32)                             # [B,T,T]

    el = enc_p["layers"][0]
    dl = dec_p["layers"][0]
    inputs = [
        src_emb, trg_emb, src_bias, trg_bias,
        el["wqkv"], el["bqkv"], el["wo"], el["bo"], el["ln1_g"], el["ln1_b"],
        el["ff_w1"], el["ff_b1"], el["ff_w2"], el["ff_b2"], el["ln2_g"], el["ln2_b"],
        dl["wqkv"], dl["bqkv"], dl["wo"], dl["bo"], dl["ln1_g"], dl["ln1_b"],
        dl["wq_c"], dl["bq_c"], dl["wkv_c"], dl["bkv_c"], dl["wo_c"], dl["bo_c"],
        dl["ln2_g"], dl["ln2_b"],
        dl["ff_w1"], dl["ff_b1"], dl["ff_w2"], dl["ff_b2"], dl["ln3_g"], dl["ln3_b"],
        dec_p["fc_out_w"], dec_p["fc_out_b"],
    ]
    in_specs = ([_bspec(src_emb.shape), _bspec(trg_emb.shape),
                 _bspec(src_bias.shape), _bspec(trg_bias.shape)]
                + [_wspec(a.shape) for a in inputs[4:]])

    out_shape = (jax.ShapeDtypeStruct((Bn, Tn, TRG_VOCAB), jnp.float32),
                 jax.ShapeDtypeStruct((Bn, NH, Tn, Sn), jnp.float32))
    out_specs = (_bspec((Bn, Tn, TRG_VOCAB)), _bspec((Bn, NH, Tn, Sn)))

    output, attention = pl.pallas_call(
        _seq2seq_kernel,
        grid=(Bn,),
        out_shape=out_shape,
        in_specs=in_specs,
        out_specs=out_specs,
        compiler_params=pltpu.CompilerParams(dimension_semantics=("parallel",)),
    )(*inputs)
    return output, attention


# ------------------------------ parameter init --------------------------------
def _init_linear(key, din, dout):
    k1, k2 = jax.random.split(key)
    w = jax.random.normal(k1, (din, dout), jnp.float32) * 0.02
    b = jax.random.normal(k2, (1, dout), jnp.float32) * 0.02
    return w, b


def _init_fused_qkv(key):
    kq, kk, kv = jax.random.split(key, 3)
    wq, bq = _init_linear(kq, HID, HID)
    wk, bk = _init_linear(kk, HID, HID)
    wv, bv = _init_linear(kv, HID, HID)
    return jnp.concatenate([wq, wk, wv], axis=1), jnp.concatenate([bq, bk, bv], axis=1)


def _ones():
    return jnp.ones((1, HID), jnp.float32)


def _zeros():
    return jnp.zeros((1, HID), jnp.float32)


def _init_enc_layer(key):
    k1, k2, k3, k4 = jax.random.split(key, 4)
    wqkv, bqkv = _init_fused_qkv(k1)
    wo, bo = _init_linear(k2, HID, HID)
    w1, b1 = _init_linear(k3, HID, PF)
    w2, b2 = _init_linear(k4, PF, HID)
    return {
        "wqkv": wqkv, "bqkv": bqkv, "wo": wo, "bo": bo,
        "ln1_g": _ones(), "ln1_b": _zeros(),
        "ff_w1": w1, "ff_b1": b1, "ff_w2": w2, "ff_b2": b2,
        "ln2_g": _ones(), "ln2_b": _zeros(),
    }


def _init_dec_layer(key):
    k1, k2, k3, k4, k5, k6 = jax.random.split(key, 6)
    wqkv, bqkv = _init_fused_qkv(k1)
    wo, bo = _init_linear(k2, HID, HID)
    wq_c, bq_c = _init_linear(k3, HID, HID)
    kk, kv = jax.random.split(k4)
    wk_c, bk_c = _init_linear(kk, HID, HID)
    wv_c, bv_c = _init_linear(kv, HID, HID)
    wo_c, bo_c = _init_linear(k5, HID, HID)
    w1, b1 = _init_linear(k6, HID, PF)
    kw2, _ = jax.random.split(k6)
    w2, b2 = _init_linear(kw2, PF, HID)
    return {
        "wqkv": wqkv, "bqkv": bqkv, "wo": wo, "bo": bo,
        "ln1_g": _ones(), "ln1_b": _zeros(),
        "wq_c": wq_c, "bq_c": bq_c,
        "wkv_c": jnp.concatenate([wk_c, wv_c], axis=1),
        "bkv_c": jnp.concatenate([bk_c, bv_c], axis=1),
        "wo_c": wo_c, "bo_c": bo_c,
        "ln2_g": _ones(), "ln2_b": _zeros(),
        "ff_w1": w1, "ff_b1": b1, "ff_w2": w2, "ff_b2": b2,
        "ln3_g": _ones(), "ln3_b": _zeros(),
    }


def init_params(seed=0):
    key = jax.random.PRNGKey(seed)
    ke, kd, k1, k2, k3, k4, k5 = jax.random.split(key, 7)
    fc_w, fc_b = _init_linear(k5, HID, TRG_VOCAB)
    enc = {
        "tok_emb": jax.random.normal(k1, (SRC_VOCAB, HID), jnp.float32) * 0.02,
        "pos_emb": jax.random.normal(k2, (max(S, T), HID), jnp.float32) * 0.02,
        "layers": [_init_enc_layer(k) for k in jax.random.split(ke, N_LAYERS)],
    }
    dec = {
        "tok_emb": jax.random.normal(k3, (TRG_VOCAB, HID), jnp.float32) * 0.02,
        "pos_emb": jax.random.normal(k4, (max(S, T), HID), jnp.float32) * 0.02,
        "layers": [_init_dec_layer(k) for k in jax.random.split(kd, N_LAYERS)],
        "fc_out_w": fc_w, "fc_out_b": fc_b,
    }
    return {"encoder": enc, "decoder": dec}


# ------------------------------------ main ------------------------------------
if __name__ == "__main__":
    params = init_params(0)

    key = jax.random.PRNGKey(0)
    ks, kt = jax.random.split(key)
    src = jax.random.randint(ks, (B, S), 1, SRC_VOCAB, dtype=jnp.int32)
    trg = jax.random.randint(kt, (B, T), 1, TRG_VOCAB, dtype=jnp.int32)
    # introduce some padding tokens so masks are exercised
    src = src.at[:, -2:].set(SRC_PAD_IDX)
    trg = trg.at[:, -1:].set(TRG_PAD_IDX)

    output, attention = jax.jit(seq2seq_forward)(params, src, trg)
    jax.block_until_ready((output, attention))

    assert output.shape == (B, T, TRG_VOCAB)
    assert attention.shape == (B, NH, T, S)
    assert bool(jnp.all(jnp.isfinite(output)))
    assert bool(jnp.all(jnp.isfinite(attention)))
    print("KERNEL_OK")
</pallas_src>

<mosaic_0001>
module attributes {stable_mosaic.version = 11 : i64} {
  func.func @_seq2seq_kernel(%arg0: i32, %arg1: memref<1x8x32xf32, #tpu.memory_space<vmem>>, %arg2: memref<1x8x32xf32, #tpu.memory_space<vmem>>, %arg3: memref<1x1x8xf32, #tpu.memory_space<vmem>>, %arg4: memref<1x8x8xf32, #tpu.memory_space<vmem>>, %arg5: memref<32x96xf32, #tpu.memory_space<vmem>>, %arg6: memref<1x96xf32, #tpu.memory_space<vmem>>, %arg7: memref<32x32xf32, #tpu.memory_space<vmem>>, %arg8: memref<1x32xf32, #tpu.memory_space<vmem>>, %arg9: memref<1x32xf32, #tpu.memory_space<vmem>>, %arg10: memref<1x32xf32, #tpu.memory_space<vmem>>, %arg11: memref<32x64xf32, #tpu.memory_space<vmem>>, %arg12: memref<1x64xf32, #tpu.memory_space<vmem>>, %arg13: memref<64x32xf32, #tpu.memory_space<vmem>>, %arg14: memref<1x32xf32, #tpu.memory_space<vmem>>, %arg15: memref<1x32xf32, #tpu.memory_space<vmem>>, %arg16: memref<1x32xf32, #tpu.memory_space<vmem>>, %arg17: memref<32x96xf32, #tpu.memory_space<vmem>>, %arg18: memref<1x96xf32, #tpu.memory_space<vmem>>, %arg19: memref<32x32xf32, #tpu.memory_space<vmem>>, %arg20: memref<1x32xf32, #tpu.memory_space<vmem>>, %arg21: memref<1x32xf32, #tpu.memory_space<vmem>>, %arg22: memref<1x32xf32, #tpu.memory_space<vmem>>, %arg23: memref<32x32xf32, #tpu.memory_space<vmem>>, %arg24: memref<1x32xf32, #tpu.memory_space<vmem>>, %arg25: memref<32x64xf32, #tpu.memory_space<vmem>>, %arg26: memref<1x64xf32, #tpu.memory_space<vmem>>, %arg27: memref<32x32xf32, #tpu.memory_space<vmem>>, %arg28: memref<1x32xf32, #tpu.memory_space<vmem>>, %arg29: memref<1x32xf32, #tpu.memory_space<vmem>>, %arg30: memref<1x32xf32, #tpu.memory_space<vmem>>, %arg31: memref<32x64xf32, #tpu.memory_space<vmem>>, %arg32: memref<1x64xf32, #tpu.memory_space<vmem>>, %arg33: memref<64x32xf32, #tpu.memory_space<vmem>>, %arg34: memref<1x32xf32, #tpu.memory_space<vmem>>, %arg35: memref<1x32xf32, #tpu.memory_space<vmem>>, %arg36: memref<1x32xf32, #tpu.memory_space<vmem>>, %arg37: memref<32x20xf32, #tpu.memory_space<vmem>>, %arg38: memref<1x20xf32, #tpu.memory_space<vmem>>, %arg39: memref<1x8x20xf32, #tpu.memory_space<vmem>>, %arg40: memref<1x4x8x8xf32, #tpu.memory_space<vmem>>) attributes {dimension_semantics = [#tpu.dimension_semantics<parallel>], iteration_bounds = array<i64: 2>, scalar_prefetch = 0 : i64, scratch_operands = 0 : i64, tpu.core_type = #tpu.core_type<tc>, window_params = [{transform_indices = @transform_0, window_bounds = array<i64: 1, 8, 32>}, {transform_indices = @transform_1, window_bounds = array<i64: 1, 8, 32>}, {transform_indices = @transform_2, window_bounds = array<i64: 1, 1, 8>}, {transform_indices = @transform_3, window_bounds = array<i64: 1, 8, 8>}, {pipeline_mode = #tpu.pipeline_mode<synchronous>, transform_indices = @transform_4, window_bounds = array<i64: 32, 96>}, {pipeline_mode = #tpu.pipeline_mode<synchronous>, transform_indices = @transform_5, window_bounds = array<i64: 1, 96>}, {pipeline_mode = #tpu.pipeline_mode<synchronous>, transform_indices = @transform_6, window_bounds = array<i64: 32, 32>}, {pipeline_mode = #tpu.pipeline_mode<synchronous>, transform_indices = @transform_7, window_bounds = array<i64: 1, 32>}, {pipeline_mode = #tpu.pipeline_mode<synchronous>, transform_indices = @transform_8, window_bounds = array<i64: 1, 32>}, {pipeline_mode = #tpu.pipeline_mode<synchronous>, transform_indices = @transform_9, window_bounds = array<i64: 1, 32>}, {pipeline_mode = #tpu.pipeline_mode<synchronous>, transform_indices = @transform_10, window_bounds = array<i64: 32, 64>}, {pipeline_mode = #tpu.pipeline_mode<synchronous>, transform_indices = @transform_11, window_bounds = array<i64: 1, 64>}, {pipeline_mode = #tpu.pipeline_mode<synchronous>, transform_indices = @transform_12, window_bounds = array<i64: 64, 32>}, {pipeline_mode = #tpu.pipeline_mode<synchronous>, transform_indices = @transform_13, window_bounds = array<i64: 1, 32>}, {pipeline_mode = #tpu.pipeline_mode<synchronous>, transform_indices = @transform_14, window_bounds = array<i64: 1, 32>}, {pipeline_mode = #tpu.pipeline_mode<synchronous>, transform_indices = @transform_15, window_bounds = array<i64: 1, 32>}, {pipeline_mode = #tpu.pipeline_mode<synchronous>, transform_indices = @transform_16, window_bounds = array<i64: 32, 96>}, {pipeline_mode = #tpu.pipeline_mode<synchronous>, transform_indices = @transform_17, window_bounds = array<i64: 1, 96>}, {pipeline_mode = #tpu.pipeline_mode<synchronous>, transform_indices = @transform_18, window_bounds = array<i64: 32, 32>}, {pipeline_mode = #tpu.pipeline_mode<synchronous>, transform_indices = @transform_19, window_bounds = array<i64: 1, 32>}, {pipeline_mode = #tpu.pipeline_mode<synchronous>, transform_indices = @transform_20, window_bounds = array<i64: 1, 32>}, {pipeline_mode = #tpu.pipeline_mode<synchronous>, transform_indices = @transform_21, window_bounds = array<i64: 1, 32>}, {pipeline_mode = #tpu.pipeline_mode<synchronous>, transform_indices = @transform_22, window_bounds = array<i64: 32, 32>}, {pipeline_mode = #tpu.pipeline_mode<synchronous>, transform_indices = @transform_23, window_bounds = array<i64: 1, 32>}, {pipeline_mode = #tpu.pipeline_mode<synchronous>, transform_indices = @transform_24, window_bounds = array<i64: 32, 64>}, {pipeline_mode = #tpu.pipeline_mode<synchronous>, transform_indices = @transform_25, window_bounds = array<i64: 1, 64>}, {pipeline_mode = #tpu.pipeline_mode<synchronous>, transform_indices = @transform_26, window_bounds = array<i64: 32, 32>}, {pipeline_mode = #tpu.pipeline_mode<synchronous>, transform_indices = @transform_27, window_bounds = array<i64: 1, 32>}, {pipeline_mode = #tpu.pipeline_mode<synchronous>, transform_indices = @transform_28, window_bounds = array<i64: 1, 32>}, {pipeline_mode = #tpu.pipeline_mode<synchronous>, transform_indices = @transform_29, window_bounds = array<i64: 1, 32>}, {pipeline_mode = #tpu.pipeline_mode<synchronous>, transform_indices = @transform_30, window_bounds = array<i64: 32, 64>}, {pipeline_mode = #tpu.pipeline_mode<synchronous>, transform_indices = @transform_31, window_bounds = array<i64: 1, 64>}, {pipeline_mode = #tpu.pipeline_mode<synchronous>, transform_indices = @transform_32, window_bounds = array<i64: 64, 32>}, {pipeline_mode = #tpu.pipeline_mode<synchronous>, transform_indices = @transform_33, window_bounds = array<i64: 1, 32>}, {pipeline_mode = #tpu.pipeline_mode<synchronous>, transform_indices = @transform_34, window_bounds = array<i64: 1, 32>}, {pipeline_mode = #tpu.pipeline_mode<synchronous>, transform_indices = @transform_35, window_bounds = array<i64: 1, 32>}, {pipeline_mode = #tpu.pipeline_mode<synchronous>, transform_indices = @transform_36, window_bounds = array<i64: 32, 20>}, {pipeline_mode = #tpu.pipeline_mode<synchronous>, transform_indices = @transform_37, window_bounds = array<i64: 1, 20>}, {transform_indices = @transform_38, window_bounds = array<i64: 1, 8, 20>}, {transform_indices = @transform_39, window_bounds = array<i64: 1, 4, 8, 8>}]} {
    %c0 = arith.constant 0 : index
    %c0_0 = arith.constant 0 : index
    %c0_1 = arith.constant 0 : index
    %0 = vector.load %arg1[%c0, %c0_0, %c0_1] : memref<1x8x32xf32, #tpu.memory_space<vmem>>, vector<1x8x32xf32>
    %1 = vector.shape_cast %0 : vector<1x8x32xf32> to vector<8x32xf32>
    %c0_2 = arith.constant 0 : index
    %c0_3 = arith.constant 0 : index
    %c0_4 = arith.constant 0 : index
    %2 = vector.load %arg3[%c0_2, %c0_3, %c0_4] : memref<1x1x8xf32, #tpu.memory_space<vmem>>, vector<1x1x8xf32>
    %3 = vector.shape_cast %2 : vector<1x1x8xf32> to vector<1x8xf32>
    %c0_5 = arith.constant 0 : index
    %c0_6 = arith.constant 0 : index
    %4 = vector.load %arg5[%c0_5, %c0_6] : memref<32x96xf32, #tpu.memory_space<vmem>>, vector<32x96xf32>
    %cst = arith.constant dense<0.000000e+00> : vector<8x96xf32>
    %5 = tpu.matmul %1, %4, %cst {dimension_numbers = #tpu.dot_dimension_numbers<[1], [0], [0], [1], [0, 0, 1, 1], [], []>} : vector<8x32xf32>, vector<32x96xf32>, vector<8x96xf32> -> vector<8x96xf32>
    %c0_7 = arith.constant 0 : index
    %c0_8 = arith.constant 0 : index
    %6 = vector.load %arg6[%c0_7, %c0_8] : memref<1x96xf32, #tpu.memory_space<vmem>>, vector<1x96xf32>
    %7 = vector.broadcast %6 : vector<1x96xf32> to vector<8x96xf32>
    %8 = arith.addf %5, %7 : vector<8x96xf32>
    %9 = vector.extract_strided_slice %8 {offsets = [0, 0], sizes = [8, 32], strides = [1, 1]} : vector<8x96xf32> to vector<8x32xf32>
    %10 = vector.extract_strided_slice %8 {offsets = [0, 32], sizes = [8, 32], strides = [1, 1]} : vector<8x96xf32> to vector<8x32xf32>
    %11 = vector.extract_strided_slice %8 {offsets = [0, 64], sizes = [8, 32], strides = [1, 1]} : vector<8x96xf32> to vector<8x32xf32>
    %12 = vector.extract_strided_slice %9 {offsets = [0, 0], sizes = [8, 8], strides = [1, 1]} : vector<8x32xf32> to vector<8x8xf32>
    %13 = vector.extract_strided_slice %10 {offsets = [0, 0], sizes = [8, 8], strides = [1, 1]} : vector<8x32xf32> to vector<8x8xf32>
    %14 = vector.extract_strided_slice %11 {offsets = [0, 0], sizes = [8, 8], strides = [1, 1]} : vector<8x32xf32> to vector<8x8xf32>
    %cst_9 = arith.constant dense<0.000000e+00> : vector<8x8xf32>
    %15 = tpu.matmul %12, %13, %cst_9 {dimension_numbers = #tpu.dot_dimension_numbers<[1], [1], [0], [0], [0, 0, 1, 0], [], []>} : vector<8x8xf32>, vector<8x8xf32>, vector<8x8xf32> -> vector<8x8xf32>
    %cst_10 = arith.constant 0.353553385 : f32
    %16 = vector.broadcast %cst_10 : f32 to vector<8x8xf32>
    %17 = arith.mulf %15, %16 : vector<8x8xf32>
    %18 = vector.broadcast %3 : vector<1x8xf32> to vector<8x8xf32>
    %19 = arith.addf %17, %18 : vector<8x8xf32>
    %cst_11 = arith.constant dense<0xFF800000> : vector<8xf32>
    %20 = vector.multi_reduction <maximumf>, %19, %cst_11 [1] : vector<8x8xf32> to vector<8xf32>
    %21 = vector.shape_cast %20 : vector<8xf32> to vector<8x1xf32>
    %22 = vector.broadcast %21 : vector<8x1xf32> to vector<8x8xf32>
    %23 = arith.subf %19, %22 : vector<8x8xf32>
    %24 = math.exp %23 : vector<8x8xf32>
    %cst_12 = arith.constant dense<0.000000e+00> : vector<8xf32>
    %25 = vector.multi_reduction <add>, %24, %cst_12 [1] : vector<8x8xf32> to vector<8xf32>
    %26 = vector.shape_cast %25 : vector<8xf32> to vector<8x1xf32>
    %27 = vector.broadcast %26 : vector<8x1xf32> to vector<8x8xf32>
    %28 = arith.divf %24, %27 : vector<8x8xf32>
    %cst_13 = arith.constant dense<0.000000e+00> : vector<8x8xf32>
    %29 = tpu.matmul %28, %14, %cst_13 {dimension_numbers = #tpu.dot_dimension_numbers<[1], [0], [0], [1], [0, 0, 1, 1], [], []>} : vector<8x8xf32>, vector<8x8xf32>, vector<8x8xf32> -> vector<8x8xf32>
    %30 = vector.extract_strided_slice %9 {offsets = [0, 8], sizes = [8, 8], strides = [1, 1]} : vector<8x32xf32> to vector<8x8xf32>
    %31 = vector.extract_strided_slice %10 {offsets = [0, 8], sizes = [8, 8], strides = [1, 1]} : vector<8x32xf32> to vector<8x8xf32>
    %32 = vector.extract_strided_slice %11 {offsets = [0, 8], sizes = [8, 8], strides = [1, 1]} : vector<8x32xf32> to vector<8x8xf32>
    %cst_14 = arith.constant dense<0.000000e+00> : vector<8x8xf32>
    %33 = tpu.matmul %30, %31, %cst_14 {dimension_numbers = #tpu.dot_dimension_numbers<[1], [1], [0], [0], [0, 0, 1, 0], [], []>} : vector<8x8xf32>, vector<8x8xf32>, vector<8x8xf32> -> vector<8x8xf32>
    %cst_15 = arith.constant 0.353553385 : f32
    %34 = vector.broadcast %cst_15 : f32 to vector<8x8xf32>
    %35 = arith.mulf %33, %34 : vector<8x8xf32>
    %36 = vector.broadcast %3 : vector<1x8xf32> to vector<8x8xf32>
    %37 = arith.addf %35, %36 : vector<8x8xf32>
    %cst_16 = arith.constant dense<0xFF800000> : vector<8xf32>
    %38 = vector.multi_reduction <maximumf>, %37, %cst_16 [1] : vector<8x8xf32> to vector<8xf32>
    %39 = vector.shape_cast %38 : vector<8xf32> to vector<8x1xf32>
    %40 = vector.broadcast %39 : vector<8x1xf32> to vector<8x8xf32>
    %41 = arith.subf %37, %40 : vector<8x8xf32>
    %42 = math.exp %41 : vector<8x8xf32>
    %cst_17 = arith.constant dense<0.000000e+00> : vector<8xf32>
    %43 = vector.multi_reduction <add>, %42, %cst_17 [1] : vector<8x8xf32> to vector<8xf32>
    %44 = vector.shape_cast %43 : vector<8xf32> to vector<8x1xf32>
    %45 = vector.broadcast %44 : vector<8x1xf32> to vector<8x8xf32>
    %46 = arith.divf %42, %45 : vector<8x8xf32>
    %cst_18 = arith.constant dense<0.000000e+00> : vector<8x8xf32>
    %47 = tpu.matmul %46, %32, %cst_18 {dimension_numbers = #tpu.dot_dimension_numbers<[1], [0], [0], [1], [0, 0, 1, 1], [], []>} : vector<8x8xf32>, vector<8x8xf32>, vector<8x8xf32> -> vector<8x8xf32>
    %48 = vector.extract_strided_slice %9 {offsets = [0, 16], sizes = [8, 8], strides = [1, 1]} : vector<8x32xf32> to vector<8x8xf32>
    %49 = vector.extract_strided_slice %10 {offsets = [0, 16], sizes = [8, 8], strides = [1, 1]} : vector<8x32xf32> to vector<8x8xf32>
    %50 = vector.extract_strided_slice %11 {offsets = [0, 16], sizes = [8, 8], strides = [1, 1]} : vector<8x32xf32> to vector<8x8xf32>
    %cst_19 = arith.constant dense<0.000000e+00> : vector<8x8xf32>
    %51 = tpu.matmul %48, %49, %cst_19 {dimension_numbers = #tpu.dot_dimension_numbers<[1], [1], [0], [0], [0, 0, 1, 0], [], []>} : vector<8x8xf32>, vector<8x8xf32>, vector<8x8xf32> -> vector<8x8xf32>
    %cst_20 = arith.constant 0.353553385 : f32
    %52 = vector.broadcast %cst_20 : f32 to vector<8x8xf32>
    %53 = arith.mulf %51, %52 : vector<8x8xf32>
    %54 = vector.broadcast %3 : vector<1x8xf32> to vector<8x8xf32>
    %55 = arith.addf %53, %54 : vector<8x8xf32>
    %cst_21 = arith.constant dense<0xFF800000> : vector<8xf32>
    %56 = vector.multi_reduction <maximumf>, %55, %cst_21 [1] : vector<8x8xf32> to vector<8xf32>
    %57 = vector.shape_cast %56 : vector<8xf32> to vector<8x1xf32>
    %58 = vector.broadcast %57 : vector<8x1xf32> to vector<8x8xf32>
    %59 = arith.subf %55, %58 : vector<8x8xf32>
    %60 = math.exp %59 : vector<8x8xf32>
    %cst_22 = arith.constant dense<0.000000e+00> : vector<8xf32>
    %61 = vector.multi_reduction <add>, %60, %cst_22 [1] : vector<8x8xf32> to vector<8xf32>
    %62 = vector.shape_cast %61 : vector<8xf32> to vector<8x1xf32>
    %63 = vector.broadcast %62 : vector<8x1xf32> to vector<8x8xf32>
    %64 = arith.divf %60, %63 : vector<8x8xf32>
    %cst_23 = arith.constant dense<0.000000e+00> : vector<8x8xf32>
    %65 = tpu.matmul %64, %50, %cst_23 {dimension_numbers = #tpu.dot_dimension_numbers<[1], [0], [0], [1], [0, 0, 1, 1], [], []>} : vector<8x8xf32>, vector<8x8xf32>, vector<8x8xf32> -> vector<8x8xf32>
    %66 = vector.extract_strided_slice %9 {offsets = [0, 24], sizes = [8, 8], strides = [1, 1]} : vector<8x32xf32> to vector<8x8xf32>
    %67 = vector.extract_strided_slice %10 {offsets = [0, 24], sizes = [8, 8], strides = [1, 1]} : vector<8x32xf32> to vector<8x8xf32>
    %68 = vector.extract_strided_slice %11 {offsets = [0, 24], sizes = [8, 8], strides = [1, 1]} : vector<8x32xf32> to vector<8x8xf32>
    %cst_24 = arith.constant dense<0.000000e+00> : vector<8x8xf32>
    %69 = tpu.matmul %66, %67, %cst_24 {dimension_numbers = #tpu.dot_dimension_numbers<[1], [1], [0], [0], [0, 0, 1, 0], [], []>} : vector<8x8xf32>, vector<8x8xf32>, vector<8x8xf32> -> vector<8x8xf32>
    %cst_25 = arith.constant 0.353553385 : f32
    %70 = vector.broadcast %cst_25 : f32 to vector<8x8xf32>
    %71 = arith.mulf %69, %70 : vector<8x8xf32>
    %72 = vector.broadcast %3 : vector<1x8xf32> to vector<8x8xf32>
    %73 = arith.addf %71, %72 : vector<8x8xf32>
    %cst_26 = arith.constant dense<0xFF800000> : vector<8xf32>
    %74 = vector.multi_reduction <maximumf>, %73, %cst_26 [1] : vector<8x8xf32> to vector<8xf32>
    %75 = vector.shape_cast %74 : vector<8xf32> to vector<8x1xf32>
    %76 = vector.broadcast %75 : vector<8x1xf32> to vector<8x8xf32>
    %77 = arith.subf %73, %76 : vector<8x8xf32>
    %78 = math.exp %77 : vector<8x8xf32>
    %cst_27 = arith.constant dense<0.000000e+00> : vector<8xf32>
    %79 = vector.multi_reduction <add>, %78, %cst_27 [1] : vector<8x8xf32> to vector<8xf32>
    %80 = vector.shape_cast %79 : vector<8xf32> to vector<8x1xf32>
    %81 = vector.broadcast %80 : vector<8x1xf32> to vector<8x8xf32>
    %82 = arith.divf %78, %81 : vector<8x8xf32>
    %cst_28 = arith.constant dense<0.000000e+00> : vector<8x8xf32>
    %83 = tpu.matmul %82, %68, %cst_28 {dimension_numbers = #tpu.dot_dimension_numbers<[1], [0], [0], [1], [0, 0, 1, 1], [], []>} : vector<8x8xf32>, vector<8x8xf32>, vector<8x8xf32> -> vector<8x8xf32>
    %84 = tpu.concatenate %29, %47, %65, %83 in 1 : vector<8x8xf32>, vector<8x8xf32>, vector<8x8xf32>, vector<8x8xf32> -> vector<8x32xf32>
    %c0_29 = arith.constant 0 : index
    %c0_30 = arith.constant 0 : index
    %85 = vector.load %arg7[%c0_29, %c0_30] : memref<32x32xf32, #tpu.memory_space<vmem>>, vector<32x32xf32>
    %cst_31 = arith.constant dense<0.000000e+00> : vector<8x32xf32>
    %86 = tpu.matmul %84, %85, %cst_31 {dimension_numbers = #tpu.dot_dimension_numbers<[1], [0], [0], [1], [0, 0, 1, 1], [], []>} : vector<8x32xf32>, vector<32x32xf32>, vector<8x32xf32> -> vector<8x32xf32>
    %c0_32 = arith.constant 0 : index
    %c0_33 = arith.constant 0 : index
    %87 = vector.load %arg8[%c0_32, %c0_33] : memref<1x32xf32, #tpu.memory_space<vmem>>, vector<1x32xf32>
    %88 = vector.broadcast %87 : vector<1x32xf32> to vector<8x32xf32>
    %89 = arith.addf %86, %88 : vector<8x32xf32>
    %90 = arith.addf %1, %89 : vector<8x32xf32>
    %c0_34 = arith.constant 0 : index
    %c0_35 = arith.constant 0 : index
    %91 = vector.load %arg9[%c0_34, %c0_35] : memref<1x32xf32, #tpu.memory_space<vmem>>, vector<1x32xf32>
    %c0_36 = arith.constant 0 : index
    %c0_37 = arith.constant 0 : index
    %92 = vector.load %arg10[%c0_36, %c0_37] : memref<1x32xf32, #tpu.memory_space<vmem>>, vector<1x32xf32>
    %cst_38 = arith.constant dense<0.000000e+00> : vector<8xf32>
    %93 = vector.multi_reduction <add>, %90, %cst_38 [1] : vector<8x32xf32> to vector<8xf32>
    %94 = vector.shape_cast %93 : vector<8xf32> to vector<8x1xf32>
    %cst_39 = arith.constant 3.200000e+01 : f32
    %95 = vector.broadcast %cst_39 : f32 to vector<8x1xf32>
    %96 = arith.divf %94, %95 : vector<8x1xf32>
    %97 = vector.broadcast %96 : vector<8x1xf32> to vector<8x32xf32>
    %98 = arith.subf %90, %97 : vector<8x32xf32>
    %99 = arith.mulf %98, %98 : vector<8x32xf32>
    %cst_40 = arith.constant dense<0.000000e+00> : vector<8xf32>
    %100 = vector.multi_reduction <add>, %99, %cst_40 [1] : vector<8x32xf32> to vector<8xf32>
    %101 = vector.shape_cast %100 : vector<8xf32> to vector<8x1xf32>
    %cst_41 = arith.constant 3.200000e+01 : f32
    %102 = vector.broadcast %cst_41 : f32 to vector<8x1xf32>
    %103 = arith.divf %101, %102 : vector<8x1xf32>
    %104 = vector.broadcast %96 : vector<8x1xf32> to vector<8x32xf32>
    %105 = arith.subf %90, %104 : vector<8x32xf32>
    %cst_42 = arith.constant 9.99999974E-6 : f32
    %106 = vector.broadcast %cst_42 : f32 to vector<8x1xf32>
    %107 = arith.addf %103, %106 : vector<8x1xf32>
    %108 = math.rsqrt %107 : vector<8x1xf32>
    %109 = vector.broadcast %108 : vector<8x1xf32> to vector<8x32xf32>
    %110 = arith.mulf %105, %109 : vector<8x32xf32>
    %111 = vector.broadcast %91 : vector<1x32xf32> to vector<8x32xf32>
    %112 = arith.mulf %110, %111 : vector<8x32xf32>
    %113 = vector.broadcast %92 : vector<1x32xf32> to vector<8x32xf32>
    %114 = arith.addf %112, %113 : vector<8x32xf32>
    %c0_43 = arith.constant 0 : index
    %c0_44 = arith.constant 0 : index
    %115 = vector.load %arg11[%c0_43, %c0_44] : memref<32x64xf32, #tpu.memory_space<vmem>>, vector<32x64xf32>
    %cst_45 = arith.constant dense<0.000000e+00> : vector<8x64xf32>
    %116 = tpu.matmul %114, %115, %cst_45 {dimension_numbers = #tpu.dot_dimension_numbers<[1], [0], [0], [1], [0, 0, 1, 1], [], []>} : vector<8x32xf32>, vector<32x64xf32>, vector<8x64xf32> -> vector<8x64xf32>
    %c0_46 = arith.constant 0 : index
    %c0_47 = arith.constant 0 : index
    %117 = vector.load %arg12[%c0_46, %c0_47] : memref<1x64xf32, #tpu.memory_space<vmem>>, vector<1x64xf32>
    %118 = vector.broadcast %117 : vector<1x64xf32> to vector<8x64xf32>
    %119 = arith.addf %116, %118 : vector<8x64xf32>
    %cst_48 = arith.constant 0.000000e+00 : f32
    %120 = vector.broadcast %cst_48 : f32 to vector<8x64xf32>
    %121 = arith.maximumf %119, %120 : vector<8x64xf32>
    %c0_49 = arith.constant 0 : index
    %c0_50 = arith.constant 0 : index
    %122 = vector.load %arg13[%c0_49, %c0_50] : memref<64x32xf32, #tpu.memory_space<vmem>>, vector<64x32xf32>
    %cst_51 = arith.constant dense<0.000000e+00> : vector<8x32xf32>
    %123 = tpu.matmul %121, %122, %cst_51 {dimension_numbers = #tpu.dot_dimension_numbers<[1], [0], [0], [1], [0, 0, 1, 1], [], []>} : vector<8x64xf32>, vector<64x32xf32>, vector<8x32xf32> -> vector<8x32xf32>
    %c0_52 = arith.constant 0 : index
    %c0_53 = arith.constant 0 : index
    %124 = vector.load %arg14[%c0_52, %c0_53] : memref<1x32xf32, #tpu.memory_space<vmem>>, vector<1x32xf32>
    %125 = vector.broadcast %124 : vector<1x32xf32> to vector<8x32xf32>
    %126 = arith.addf %123, %125 : vector<8x32xf32>
    %127 = arith.addf %114, %126 : vector<8x32xf32>
    %c0_54 = arith.constant 0 : index
    %c0_55 = arith.constant 0 : index
    %128 = vector.load %arg15[%c0_54, %c0_55] : memref<1x32xf32, #tpu.memory_space<vmem>>, vector<1x32xf32>
    %c0_56 = arith.constant 0 : index
    %c0_57 = arith.constant 0 : index
    %129 = vector.load %arg16[%c0_56, %c0_57] : memref<1x32xf32, #tpu.memory_space<vmem>>, vector<1x32xf32>
    %cst_58 = arith.constant dense<0.000000e+00> : vector<8xf32>
    %130 = vector.multi_reduction <add>, %127, %cst_58 [1] : vector<8x32xf32> to vector<8xf32>
    %131 = vector.shape_cast %130 : vector<8xf32> to vector<8x1xf32>
    %cst_59 = arith.constant 3.200000e+01 : f32
    %132 = vector.broadcast %cst_59 : f32 to vector<8x1xf32>
    %133 = arith.divf %131, %132 : vector<8x1xf32>
    %134 = vector.broadcast %133 : vector<8x1xf32> to vector<8x32xf32>
    %135 = arith.subf %127, %134 : vector<8x32xf32>
    %136 = arith.mulf %135, %135 : vector<8x32xf32>
    %cst_60 = arith.constant dense<0.000000e+00> : vector<8xf32>
    %137 = vector.multi_reduction <add>, %136, %cst_60 [1] : vector<8x32xf32> to vector<8xf32>
    %138 = vector.shape_cast %137 : vector<8xf32> to vector<8x1xf32>
    %cst_61 = arith.constant 3.200000e+01 : f32
    %139 = vector.broadcast %cst_61 : f32 to vector<8x1xf32>
    %140 = arith.divf %138, %139 : vector<8x1xf32>
    %141 = vector.broadcast %133 : vector<8x1xf32> to vector<8x32xf32>
    %142 = arith.subf %127, %141 : vector<8x32xf32>
    %cst_62 = arith.constant 9.99999974E-6 : f32
    %143 = vector.broadcast %cst_62 : f32 to vector<8x1xf32>
    %144 = arith.addf %140, %143 : vector<8x1xf32>
    %145 = math.rsqrt %144 : vector<8x1xf32>
    %146 = vector.broadcast %145 : vector<8x1xf32> to vector<8x32xf32>
    %147 = arith.mulf %142, %146 : vector<8x32xf32>
    %148 = vector.broadcast %128 : vector<1x32xf32> to vector<8x32xf32>
    %149 = arith.mulf %147, %148 : vector<8x32xf32>
    %150 = vector.broadcast %129 : vector<1x32xf32> to vector<8x32xf32>
    %151 = arith.addf %149, %150 : vector<8x32xf32>
    %c0_63 = arith.constant 0 : index
    %c0_64 = arith.constant 0 : index
    %c0_65 = arith.constant 0 : index
    %152 = vector.load %arg2[%c0_63, %c0_64, %c0_65] : memref<1x8x32xf32, #tpu.memory_space<vmem>>, vector<1x8x32xf32>
    %153 = vector.shape_cast %152 : vector<1x8x32xf32> to vector<8x32xf32>
    %c0_66 = arith.constant 0 : index
    %c0_67 = arith.constant 0 : index
    %c0_68 = arith.constant 0 : index
    %154 = vector.load %arg4[%c0_66, %c0_67, %c0_68] : memref<1x8x8xf32, #tpu.memory_space<vmem>>, vector<1x8x8xf32>
    %155 = vector.shape_cast %154 : vector<1x8x8xf32> to vector<8x8xf32>
    %c0_69 = arith.constant 0 : index
    %c0_70 = arith.constant 0 : index
    %156 = vector.load %arg17[%c0_69, %c0_70] : memref<32x96xf32, #tpu.memory_space<vmem>>, vector<32x96xf32>
    %cst_71 = arith.constant dense<0.000000e+00> : vector<8x96xf32>
    %157 = tpu.matmul %153, %156, %cst_71 {dimension_numbers = #tpu.dot_dimension_numbers<[1], [0], [0], [1], [0, 0, 1, 1], [], []>} : vector<8x32xf32>, vector<32x96xf32>, vector<8x96xf32> -> vector<8x96xf32>
    %c0_72 = arith.constant 0 : index
    %c0_73 = arith.constant 0 : index
    %158 = vector.load %arg18[%c0_72, %c0_73] : memref<1x96xf32, #tpu.memory_space<vmem>>, vector<1x96xf32>
    %159 = vector.broadcast %158 : vector<1x96xf32> to vector<8x96xf32>
    %160 = arith.addf %157, %159 : vector<8x96xf32>
    %161 = vector.extract_strided_slice %160 {offsets = [0, 0], sizes = [8, 32], strides = [1, 1]} : vector<8x96xf32> to vector<8x32xf32>
    %162 = vector.extract_strided_slice %160 {offsets = [0, 32], sizes = [8, 32], strides = [1, 1]} : vector<8x96xf32> to vector<8x32xf32>
    %163 = vector.extract_strided_slice %160 {offsets = [0, 64], sizes = [8, 32], strides = [1, 1]} : vector<8x96xf32> to vector<8x32xf32>
    %164 = vector.extract_strided_slice %161 {offsets = [0, 0], sizes = [8, 8], strides = [1, 1]} : vector<8x32xf32> to vector<8x8xf32>
    %165 = vector.extract_strided_slice %162 {offsets = [0, 0], sizes = [8, 8], strides = [1, 1]} : vector<8x32xf32> to vector<8x8xf32>
    %166 = vector.extract_strided_slice %163 {offsets = [0, 0], sizes = [8, 8], strides = [1, 1]} : vector<8x32xf32> to vector<8x8xf32>
    %cst_74 = arith.constant dense<0.000000e+00> : vector<8x8xf32>
    %167 = tpu.matmul %164, %165, %cst_74 {dimension_numbers = #tpu.dot_dimension_numbers<[1], [1], [0], [0], [0, 0, 1, 0], [], []>} : vector<8x8xf32>, vector<8x8xf32>, vector<8x8xf32> -> vector<8x8xf32>
    %cst_75 = arith.constant 0.353553385 : f32
    %168 = vector.broadcast %cst_75 : f32 to vector<8x8xf32>
    %169 = arith.mulf %167, %168 : vector<8x8xf32>
    %170 = arith.addf %169, %155 : vector<8x8xf32>
    %cst_76 = arith.constant dense<0xFF800000> : vector<8xf32>
    %171 = vector.multi_reduction <maximumf>, %170, %cst_76 [1] : vector<8x8xf32> to vector<8xf32>
    %172 = vector.shape_cast %171 : vector<8xf32> to vector<8x1xf32>
    %173 = vector.broadcast %172 : vector<8x1xf32> to vector<8x8xf32>
    %174 = arith.subf %170, %173 : vector<8x8xf32>
    %175 = math.exp %174 : vector<8x8xf32>
    %cst_77 = arith.constant dense<0.000000e+00> : vector<8xf32>
    %176 = vector.multi_reduction <add>, %175, %cst_77 [1] : vector<8x8xf32> to vector<8xf32>
    %177 = vector.shape_cast %176 : vector<8xf32> to vector<8x1xf32>
    %178 = vector.broadcast %177 : vector<8x1xf32> to vector<8x8xf32>
    %179 = arith.divf %175, %178 : vector<8x8xf32>
    %cst_78 = arith.constant dense<0.000000e+00> : vector<8x8xf32>
    %180 = tpu.matmul %179, %166, %cst_78 {dimension_numbers = #tpu.dot_dimension_numbers<[1], [0], [0], [1], [0, 0, 1, 1], [], []>} : vector<8x8xf32>, vector<8x8xf32>, vector<8x8xf32> -> vector<8x8xf32>
    %181 = vector.extract_strided_slice %161 {offsets = [0, 8], sizes = [8, 8], strides = [1, 1]} : vector<8x32xf32> to vector<8x8xf32>
    %182 = vector.extract_strided_slice %162 {offsets = [0, 8], sizes = [8, 8], strides = [1, 1]} : vector<8x32xf32> to vector<8x8xf32>
    %183 = vector.extract_strided_slice %163 {offsets = [0, 8], sizes = [8, 8], strides = [1, 1]} : vector<8x32xf32> to vector<8x8xf32>
    %cst_79 = arith.constant dense<0.000000e+00> : vector<8x8xf32>
    %184 = tpu.matmul %181, %182, %cst_79 {dimension_numbers = #tpu.dot_dimension_numbers<[1], [1], [0], [0], [0, 0, 1, 0], [], []>} : vector<8x8xf32>, vector<8x8xf32>, vector<8x8xf32> -> vector<8x8xf32>
    %cst_80 = arith.constant 0.353553385 : f32
    %185 = vector.broadcast %cst_80 : f32 to vector<8x8xf32>
    %186 = arith.mulf %184, %185 : vector<8x8xf32>
    %187 = arith.addf %186, %155 : vector<8x8xf32>
    %cst_81 = arith.constant dense<0xFF800000> : vector<8xf32>
    %188 = vector.multi_reduction <maximumf>, %187, %cst_81 [1] : vector<8x8xf32> to vector<8xf32>
    %189 = vector.shape_cast %188 : vector<8xf32> to vector<8x1xf32>
    %190 = vector.broadcast %189 : vector<8x1xf32> to vector<8x8xf32>
    %191 = arith.subf %187, %190 : vector<8x8xf32>
    %192 = math.exp %191 : vector<8x8xf32>
    %cst_82 = arith.constant dense<0.000000e+00> : vector<8xf32>
    %193 = vector.multi_reduction <add>, %192, %cst_82 [1] : vector<8x8xf32> to vector<8xf32>
    %194 = vector.shape_cast %193 : vector<8xf32> to vector<8x1xf32>
    %195 = vector.broadcast %194 : vector<8x1xf32> to vector<8x8xf32>
    %196 = arith.divf %192, %195 : vector<8x8xf32>
    %cst_83 = arith.constant dense<0.000000e+00> : vector<8x8xf32>
    %197 = tpu.matmul %196, %183, %cst_83 {dimension_numbers = #tpu.dot_dimension_numbers<[1], [0], [0], [1], [0, 0, 1, 1], [], []>} : vector<8x8xf32>, vector<8x8xf32>, vector<8x8xf32> -> vector<8x8xf32>
    %198 = vector.extract_strided_slice %161 {offsets = [0, 16], sizes = [8, 8], strides = [1, 1]} : vector<8x32xf32> to vector<8x8xf32>
    %199 = vector.extract_strided_slice %162 {offsets = [0, 16], sizes = [8, 8], strides = [1, 1]} : vector<8x32xf32> to vector<8x8xf32>
    %200 = vector.extract_strided_slice %163 {offsets = [0, 16], sizes = [8, 8], strides = [1, 1]} : vector<8x32xf32> to vector<8x8xf32>
    %cst_84 = arith.constant dense<0.000000e+00> : vector<8x8xf32>
    %201 = tpu.matmul %198, %199, %cst_84 {dimension_numbers = #tpu.dot_dimension_numbers<[1], [1], [0], [0], [0, 0, 1, 0], [], []>} : vector<8x8xf32>, vector<8x8xf32>, vector<8x8xf32> -> vector<8x8xf32>
    %cst_85 = arith.constant 0.353553385 : f32
    %202 = vector.broadcast %cst_85 : f32 to vector<8x8xf32>
    %203 = arith.mulf %201, %202 : vector<8x8xf32>
    %204 = arith.addf %203, %155 : vector<8x8xf32>
    %cst_86 = arith.constant dense<0xFF800000> : vector<8xf32>
    %205 = vector.multi_reduction <maximumf>, %204, %cst_86 [1] : vector<8x8xf32> to vector<8xf32>
    %206 = vector.shape_cast %205 : vector<8xf32> to vector<8x1xf32>
    %207 = vector.broadcast %206 : vector<8x1xf32> to vector<8x8xf32>
    %208 = arith.subf %204, %207 : vector<8x8xf32>
    %209 = math.exp %208 : vector<8x8xf32>
    %cst_87 = arith.constant dense<0.000000e+00> : vector<8xf32>
    %210 = vector.multi_reduction <add>, %209, %cst_87 [1] : vector<8x8xf32> to vector<8xf32>
    %211 = vector.shape_cast %210 : vector<8xf32> to vector<8x1xf32>
    %212 = vector.broadcast %211 : vector<8x1xf32> to vector<8x8xf32>
    %213 = arith.divf %209, %212 : vector<8x8xf32>
    %cst_88 = arith.constant dense<0.000000e+00> : vector<8x8xf32>
    %214 = tpu.matmul %213, %200, %cst_88 {dimension_numbers = #tpu.dot_dimension_numbers<[1], [0], [0], [1], [0, 0, 1, 1], [], []>} : vector<8x8xf32>, vector<8x8xf32>, vector<8x8xf32> -> vector<8x8xf32>
    %215 = vector.extract_strided_slice %161 {offsets = [0, 24], sizes = [8, 8], strides = [1, 1]} : vector<8x32xf32> to vector<8x8xf32>
    %216 = vector.extract_strided_slice %162 {offsets = [0, 24], sizes = [8, 8], strides = [1, 1]} : vector<8x32xf32> to vector<8x8xf32>
    %217 = vector.extract_strided_slice %163 {offsets = [0, 24], sizes = [8, 8], strides = [1, 1]} : vector<8x32xf32> to vector<8x8xf32>
    %cst_89 = arith.constant dense<0.000000e+00> : vector<8x8xf32>
    %218 = tpu.matmul %215, %216, %cst_89 {dimension_numbers = #tpu.dot_dimension_numbers<[1], [1], [0], [0], [0, 0, 1, 0], [], []>} : vector<8x8xf32>, vector<8x8xf32>, vector<8x8xf32> -> vector<8x8xf32>
    %cst_90 = arith.constant 0.353553385 : f32
    %219 = vector.broadcast %cst_90 : f32 to vector<8x8xf32>
    %220 = arith.mulf %218, %219 : vector<8x8xf32>
    %221 = arith.addf %220, %155 : vector<8x8xf32>
    %cst_91 = arith.constant dense<0xFF800000> : vector<8xf32>
    %222 = vector.multi_reduction <maximumf>, %221, %cst_91 [1] : vector<8x8xf32> to vector<8xf32>
    %223 = vector.shape_cast %222 : vector<8xf32> to vector<8x1xf32>
    %224 = vector.broadcast %223 : vector<8x1xf32> to vector<8x8xf32>
    %225 = arith.subf %221, %224 : vector<8x8xf32>
    %226 = math.exp %225 : vector<8x8xf32>
    %cst_92 = arith.constant dense<0.000000e+00> : vector<8xf32>
    %227 = vector.multi_reduction <add>, %226, %cst_92 [1] : vector<8x8xf32> to vector<8xf32>
    %228 = vector.shape_cast %227 : vector<8xf32> to vector<8x1xf32>
    %229 = vector.broadcast %228 : vector<8x1xf32> to vector<8x8xf32>
    %230 = arith.divf %226, %229 : vector<8x8xf32>
    %cst_93 = arith.constant dense<0.000000e+00> : vector<8x8xf32>
    %231 = tpu.matmul %230, %217, %cst_93 {dimension_numbers = #tpu.dot_dimension_numbers<[1], [0], [0], [1], [0, 0, 1, 1], [], []>} : vector<8x8xf32>, vector<8x8xf32>, vector<8x8xf32> -> vector<8x8xf32>
    %232 = tpu.concatenate %180, %197, %214, %231 in 1 : vector<8x8xf32>, vector<8x8xf32>, vector<8x8xf32>, vector<8x8xf32> -> vector<8x32xf32>
    %c0_94 = arith.constant 0 : index
    %c0_95 = arith.constant 0 : index
    %233 = vector.load %arg19[%c0_94, %c0_95] : memref<32x32xf32, #tpu.memory_space<vmem>>, vector<32x32xf32>
    %cst_96 = arith.constant dense<0.000000e+00> : vector<8x32xf32>
    %234 = tpu.matmul %232, %233, %cst_96 {dimension_numbers = #tpu.dot_dimension_numbers<[1], [0], [0], [1], [0, 0, 1, 1], [], []>} : vector<8x32xf32>, vector<32x32xf32>, vector<8x32xf32> -> vector<8x32xf32>
    %c0_97 = arith.constant 0 : index
    %c0_98 = arith.constant 0 : index
    %235 = vector.load %arg20[%c0_97, %c0_98] : memref<1x32xf32, #tpu.memory_space<vmem>>, vector<1x32xf32>
    %236 = vector.broadcast %235 : vector<1x32xf32> to vector<8x32xf32>
    %237 = arith.addf %234, %236 : vector<8x32xf32>
    %238 = arith.addf %153, %237 : vector<8x32xf32>
    %c0_99 = arith.constant 0 : index
    %c0_100 = arith.constant 0 : index
    %239 = vector.load %arg21[%c0_99, %c0_100] : memref<1x32xf32, #tpu.memory_space<vmem>>, vector<1x32xf32>
    %c0_101 = arith.constant 0 : index
    %c0_102 = arith.constant 0 : index
    %240 = vector.load %arg22[%c0_101, %c0_102] : memref<1x32xf32, #tpu.memory_space<vmem>>, vector<1x32xf32>
    %cst_103 = arith.constant dense<0.000000e+00> : vector<8xf32>
    %241 = vector.multi_reduction <add>, %238, %cst_103 [1] : vector<8x32xf32> to vector<8xf32>
    %242 = vector.shape_cast %241 : vector<8xf32> to vector<8x1xf32>
    %cst_104 = arith.constant 3.200000e+01 : f32
    %243 = vector.broadcast %cst_104 : f32 to vector<8x1xf32>
    %244 = arith.divf %242, %243 : vector<8x1xf32>
    %245 = vector.broadcast %244 : vector<8x1xf32> to vector<8x32xf32>
    %246 = arith.subf %238, %245 : vector<8x32xf32>
    %247 = arith.mulf %246, %246 : vector<8x32xf32>
    %cst_105 = arith.constant dense<0.000000e+00> : vector<8xf32>
    %248 = vector.multi_reduction <add>, %247, %cst_105 [1] : vector<8x32xf32> to vector<8xf32>
    %249 = vector.shape_cast %248 : vector<8xf32> to vector<8x1xf32>
    %cst_106 = arith.constant 3.200000e+01 : f32
    %250 = vector.broadcast %cst_106 : f32 to vector<8x1xf32>
    %251 = arith.divf %249, %250 : vector<8x1xf32>
    %252 = vector.broadcast %244 : vector<8x1xf32> to vector<8x32xf32>
    %253 = arith.subf %238, %252 : vector<8x32xf32>
    %cst_107 = arith.constant 9.99999974E-6 : f32
    %254 = vector.broadcast %cst_107 : f32 to vector<8x1xf32>
    %255 = arith.addf %251, %254 : vector<8x1xf32>
    %256 = math.rsqrt %255 : vector<8x1xf32>
    %257 = vector.broadcast %256 : vector<8x1xf32> to vector<8x32xf32>
    %258 = arith.mulf %253, %257 : vector<8x32xf32>
    %259 = vector.broadcast %239 : vector<1x32xf32> to vector<8x32xf32>
    %260 = arith.mulf %258, %259 : vector<8x32xf32>
    %261 = vector.broadcast %240 : vector<1x32xf32> to vector<8x32xf32>
    %262 = arith.addf %260, %261 : vector<8x32xf32>
    %c0_108 = arith.constant 0 : index
    %c0_109 = arith.constant 0 : index
    %263 = vector.load %arg23[%c0_108, %c0_109] : memref<32x32xf32, #tpu.memory_space<vmem>>, vector<32x32xf32>
    %cst_110 = arith.constant dense<0.000000e+00> : vector<8x32xf32>
    %264 = tpu.matmul %262, %263, %cst_110 {dimension_numbers = #tpu.dot_dimension_numbers<[1], [0], [0], [1], [0, 0, 1, 1], [], []>} : vector<8x32xf32>, vector<32x32xf32>, vector<8x32xf32> -> vector<8x32xf32>
    %c0_111 = arith.constant 0 : index
    %c0_112 = arith.constant 0 : index
    %265 = vector.load %arg24[%c0_111, %c0_112] : memref<1x32xf32, #tpu.memory_space<vmem>>, vector<1x32xf32>
    %266 = vector.broadcast %265 : vector<1x32xf32> to vector<8x32xf32>
    %267 = arith.addf %264, %266 : vector<8x32xf32>
    %c0_113 = arith.constant 0 : index
    %c0_114 = arith.constant 0 : index
    %268 = vector.load %arg25[%c0_113, %c0_114] : memref<32x64xf32, #tpu.memory_space<vmem>>, vector<32x64xf32>
    %cst_115 = arith.constant dense<0.000000e+00> : vector<8x64xf32>
    %269 = tpu.matmul %151, %268, %cst_115 {dimension_numbers = #tpu.dot_dimension_numbers<[1], [0], [0], [1], [0, 0, 1, 1], [], []>} : vector<8x32xf32>, vector<32x64xf32>, vector<8x64xf32> -> vector<8x64xf32>
    %c0_116 = arith.constant 0 : index
    %c0_117 = arith.constant 0 : index
    %270 = vector.load %arg26[%c0_116, %c0_117] : memref<1x64xf32, #tpu.memory_space<vmem>>, vector<1x64xf32>
    %271 = vector.broadcast %270 : vector<1x64xf32> to vector<8x64xf32>
    %272 = arith.addf %269, %271 : vector<8x64xf32>
    %273 = vector.extract_strided_slice %272 {offsets = [0, 0], sizes = [8, 32], strides = [1, 1]} : vector<8x64xf32> to vector<8x32xf32>
    %274 = vector.extract_strided_slice %272 {offsets = [0, 32], sizes = [8, 32], strides = [1, 1]} : vector<8x64xf32> to vector<8x32xf32>
    %275 = vector.extract_strided_slice %267 {offsets = [0, 0], sizes = [8, 8], strides = [1, 1]} : vector<8x32xf32> to vector<8x8xf32>
    %276 = vector.extract_strided_slice %273 {offsets = [0, 0], sizes = [8, 8], strides = [1, 1]} : vector<8x32xf32> to vector<8x8xf32>
    %277 = vector.extract_strided_slice %274 {offsets = [0, 0], sizes = [8, 8], strides = [1, 1]} : vector<8x32xf32> to vector<8x8xf32>
    %cst_118 = arith.constant dense<0.000000e+00> : vector<8x8xf32>
    %278 = tpu.matmul %275, %276, %cst_118 {dimension_numbers = #tpu.dot_dimension_numbers<[1], [1], [0], [0], [0, 0, 1, 0], [], []>} : vector<8x8xf32>, vector<8x8xf32>, vector<8x8xf32> -> vector<8x8xf32>
    %cst_119 = arith.constant 0.353553385 : f32
    %279 = vector.broadcast %cst_119 : f32 to vector<8x8xf32>
    %280 = arith.mulf %278, %279 : vector<8x8xf32>
    %281 = vector.broadcast %3 : vector<1x8xf32> to vector<8x8xf32>
    %282 = arith.addf %280, %281 : vector<8x8xf32>
    %cst_120 = arith.constant dense<0xFF800000> : vector<8xf32>
    %283 = vector.multi_reduction <maximumf>, %282, %cst_120 [1] : vector<8x8xf32> to vector<8xf32>
    %284 = vector.shape_cast %283 : vector<8xf32> to vector<8x1xf32>
    %285 = vector.broadcast %284 : vector<8x1xf32> to vector<8x8xf32>
    %286 = arith.subf %282, %285 : vector<8x8xf32>
    %287 = math.exp %286 : vector<8x8xf32>
    %cst_121 = arith.constant dense<0.000000e+00> : vector<8xf32>
    %288 = vector.multi_reduction <add>, %287, %cst_121 [1] : vector<8x8xf32> to vector<8xf32>
    %289 = vector.shape_cast %288 : vector<8xf32> to vector<8x1xf32>
    %290 = vector.broadcast %289 : vector<8x1xf32> to vector<8x8xf32>
    %291 = arith.divf %287, %290 : vector<8x8xf32>
    %c0_122 = arith.constant 0 : index
    %c0_123 = arith.constant 0 : index
    %c0_124 = arith.constant 0 : index
    %c0_125 = arith.constant 0 : index
    %292 = vector.load %arg40[%c0_122, %c0_123, %c0_124, %c0_125] : memref<1x4x8x8xf32, #tpu.memory_space<vmem>>, vector<1x1x8x8xf32>
    %293 = vector.shape_cast %292 : vector<1x1x8x8xf32> to vector<8x8xf32>
    %294 = vector.shape_cast %291 : vector<8x8xf32> to vector<1x1x8x8xf32>
    tpu.vector_store %arg40[%c0_122, %c0_123, %c0_124, %c0_125], %294 {strides = array<i32>} : memref<1x4x8x8xf32, #tpu.memory_space<vmem>>, vector<1x1x8x8xf32>,
    %cst_126 = arith.constant dense<0.000000e+00> : vector<8x8xf32>
    %295 = tpu.matmul %291, %277, %cst_126 {dimension_numbers = #tpu.dot_dimension_numbers<[1], [0], [0], [1], [0, 0, 1, 1], [], []>} : vector<8x8xf32>, vector<8x8xf32>, vector<8x8xf32> -> vector<8x8xf32>
    %296 = vector.extract_strided_slice %267 {offsets = [0, 8], sizes = [8, 8], strides = [1, 1]} : vector<8x32xf32> to vector<8x8xf32>
    %297 = vector.extract_strided_slice %273 {offsets = [0, 8], sizes = [8, 8], strides = [1, 1]} : vector<8x32xf32> to vector<8x8xf32>
    %298 = vector.extract_strided_slice %274 {offsets = [0, 8], sizes = [8, 8], strides = [1, 1]} : vector<8x32xf32> to vector<8x8xf32>
    %cst_127 = arith.constant dense<0.000000e+00> : vector<8x8xf32>
    %299 = tpu.matmul %296, %297, %cst_127 {dimension_numbers = #tpu.dot_dimension_numbers<[1], [1], [0], [0], [0, 0, 1, 0], [], []>} : vector<8x8xf32>, vector<8x8xf32>, vector<8x8xf32> -> vector<8x8xf32>
    %cst_128 = arith.constant 0.353553385 : f32
    %300 = vector.broadcast %cst_128 : f32 to vector<8x8xf32>
    %301 = arith.mulf %299, %300 : vector<8x8xf32>
    %302 = vector.broadcast %3 : vector<1x8xf32> to vector<8x8xf32>
    %303 = arith.addf %301, %302 : vector<8x8xf32>
    %cst_129 = arith.constant dense<0xFF800000> : vector<8xf32>
    %304 = vector.multi_reduction <maximumf>, %303, %cst_129 [1] : vector<8x8xf32> to vector<8xf32>
    %305 = vector.shape_cast %304 : vector<8xf32> to vector<8x1xf32>
    %306 = vector.broadcast %305 : vector<8x1xf32> to vector<8x8xf32>
    %307 = arith.subf %303, %306 : vector<8x8xf32>
    %308 = math.exp %307 : vector<8x8xf32>
    %cst_130 = arith.constant dense<0.000000e+00> : vector<8xf32>
    %309 = vector.multi_reduction <add>, %308, %cst_130 [1] : vector<8x8xf32> to vector<8xf32>
    %310 = vector.shape_cast %309 : vector<8xf32> to vector<8x1xf32>
    %311 = vector.broadcast %310 : vector<8x1xf32> to vector<8x8xf32>
    %312 = arith.divf %308, %311 : vector<8x8xf32>
    %c0_131 = arith.constant 0 : index
    %c1 = arith.constant 1 : index
    %c0_132 = arith.constant 0 : index
    %c0_133 = arith.constant 0 : index
    %313 = vector.load %arg40[%c0_131, %c1, %c0_132, %c0_133] : memref<1x4x8x8xf32, #tpu.memory_space<vmem>>, vector<1x1x8x8xf32>
    %314 = vector.shape_cast %313 : vector<1x1x8x8xf32> to vector<8x8xf32>
    %315 = vector.shape_cast %312 : vector<8x8xf32> to vector<1x1x8x8xf32>
    tpu.vector_store %arg40[%c0_131, %c1, %c0_132, %c0_133], %315 {strides = array<i32>} : memref<1x4x8x8xf32, #tpu.memory_space<vmem>>, vector<1x1x8x8xf32>,
    %cst_134 = arith.constant dense<0.000000e+00> : vector<8x8xf32>
    %316 = tpu.matmul %312, %298, %cst_134 {dimension_numbers = #tpu.dot_dimension_numbers<[1], [0], [0], [1], [0, 0, 1, 1], [], []>} : vector<8x8xf32>, vector<8x8xf32>, vector<8x8xf32> -> vector<8x8xf32>
    %317 = vector.extract_strided_slice %267 {offsets = [0, 16], sizes = [8, 8], strides = [1, 1]} : vector<8x32xf32> to vector<8x8xf32>
    %318 = vector.extract_strided_slice %273 {offsets = [0, 16], sizes = [8, 8], strides = [1, 1]} : vector<8x32xf32> to vector<8x8xf32>
    %319 = vector.extract_strided_slice %274 {offsets = [0, 16], sizes = [8, 8], strides = [1, 1]} : vector<8x32xf32> to vector<8x8xf32>
    %cst_135 = arith.constant dense<0.000000e+00> : vector<8x8xf32>
    %320 = tpu.matmul %317, %318, %cst_135 {dimension_numbers = #tpu.dot_dimension_numbers<[1], [1], [0], [0], [0, 0, 1, 0], [], []>} : vector<8x8xf32>, vector<8x8xf32>, vector<8x8xf32> -> vector<8x8xf32>
    %cst_136 = arith.constant 0.353553385 : f32
    %321 = vector.broadcast %cst_136 : f32 to vector<8x8xf32>
    %322 = arith.mulf %320, %321 : vector<8x8xf32>
    %323 = vector.broadcast %3 : vector<1x8xf32> to vector<8x8xf32>
    %324 = arith.addf %322, %323 : vector<8x8xf32>
    %cst_137 = arith.constant dense<0xFF800000> : vector<8xf32>
    %325 = vector.multi_reduction <maximumf>, %324, %cst_137 [1] : vector<8x8xf32> to vector<8xf32>
    %326 = vector.shape_cast %325 : vector<8xf32> to vector<8x1xf32>
    %327 = vector.broadcast %326 : vector<8x1xf32> to vector<8x8xf32>
    %328 = arith.subf %324, %327 : vector<8x8xf32>
    %329 = math.exp %328 : vector<8x8xf32>
    %cst_138 = arith.constant dense<0.000000e+00> : vector<8xf32>
    %330 = vector.multi_reduction <add>, %329, %cst_138 [1] : vector<8x8xf32> to vector<8xf32>
    %331 = vector.shape_cast %330 : vector<8xf32> to vector<8x1xf32>
    %332 = vector.broadcast %331 : vector<8x1xf32> to vector<8x8xf32>
    %333 = arith.divf %329, %332 : vector<8x8xf32>
    %c0_139 = arith.constant 0 : index
    %c2 = arith.constant 2 : index
    %c0_140 = arith.constant 0 : index
    %c0_141 = arith.constant 0 : index
    %334 = vector.load %arg40[%c0_139, %c2, %c0_140, %c0_141] : memref<1x4x8x8xf32, #tpu.memory_space<vmem>>, vector<1x1x8x8xf32>
    %335 = vector.shape_cast %334 : vector<1x1x8x8xf32> to vector<8x8xf32>
    %336 = vector.shape_cast %333 : vector<8x8xf32> to vector<1x1x8x8xf32>
    tpu.vector_store %arg40[%c0_139, %c2, %c0_140, %c0_141], %336 {strides = array<i32>} : memref<1x4x8x8xf32, #tpu.memory_space<vmem>>, vector<1x1x8x8xf32>,
    %cst_142 = arith.constant dense<0.000000e+00> : vector<8x8xf32>
    %337 = tpu.matmul %333, %319, %cst_142 {dimension_numbers = #tpu.dot_dimension_numbers<[1], [0], [0], [1], [0, 0, 1, 1], [], []>} : vector<8x8xf32>, vector<8x8xf32>, vector<8x8xf32> -> vector<8x8xf32>
    %338 = vector.extract_strided_slice %267 {offsets = [0, 24], sizes = [8, 8], strides = [1, 1]} : vector<8x32xf32> to vector<8x8xf32>
    %339 = vector.extract_strided_slice %273 {offsets = [0, 24], sizes = [8, 8], strides = [1, 1]} : vector<8x32xf32> to vector<8x8xf32>
    %340 = vector.extract_strided_slice %274 {offsets = [0, 24], sizes = [8, 8], strides = [1, 1]} : vector<8x32xf32> to vector<8x8xf32>
    %cst_143 = arith.constant dense<0.000000e+00> : vector<8x8xf32>
    %341 = tpu.matmul %338, %339, %cst_143 {dimension_numbers = #tpu.dot_dimension_numbers<[1], [1], [0], [0], [0, 0, 1, 0], [], []>} : vector<8x8xf32>, vector<8x8xf32>, vector<8x8xf32> -> vector<8x8xf32>
    %cst_144 = arith.constant 0.353553385 : f32
    %342 = vector.broadcast %cst_144 : f32 to vector<8x8xf32>
    %343 = arith.mulf %341, %342 : vector<8x8xf32>
    %344 = vector.broadcast %3 : vector<1x8xf32> to vector<8x8xf32>
    %345 = arith.addf %343, %344 : vector<8x8xf32>
    %cst_145 = arith.constant dense<0xFF800000> : vector<8xf32>
    %346 = vector.multi_reduction <maximumf>, %345, %cst_145 [1] : vector<8x8xf32> to vector<8xf32>
    %347 = vector.shape_cast %346 : vector<8xf32> to vector<8x1xf32>
    %348 = vector.broadcast %347 : vector<8x1xf32> to vector<8x8xf32>
    %349 = arith.subf %345, %348 : vector<8x8xf32>
    %350 = math.exp %349 : vector<8x8xf32>
    %cst_146 = arith.constant dense<0.000000e+00> : vector<8xf32>
    %351 = vector.multi_reduction <add>, %350, %cst_146 [1] : vector<8x8xf32> to vector<8xf32>
    %352 = vector.shape_cast %351 : vector<8xf32> to vector<8x1xf32>
    %353 = vector.broadcast %352 : vector<8x1xf32> to vector<8x8xf32>
    %354 = arith.divf %350, %353 : vector<8x8xf32>
    %c0_147 = arith.constant 0 : index
    %c3 = arith.constant 3 : index
    %c0_148 = arith.constant 0 : index
    %c0_149 = arith.constant 0 : index
    %355 = vector.load %arg40[%c0_147, %c3, %c0_148, %c0_149] : memref<1x4x8x8xf32, #tpu.memory_space<vmem>>, vector<1x1x8x8xf32>
    %356 = vector.shape_cast %355 : vector<1x1x8x8xf32> to vector<8x8xf32>
    %357 = vector.shape_cast %354 : vector<8x8xf32> to vector<1x1x8x8xf32>
    tpu.vector_store %arg40[%c0_147, %c3, %c0_148, %c0_149], %357 {strides = array<i32>} : memref<1x4x8x8xf32, #tpu.memory_space<vmem>>, vector<1x1x8x8xf32>,
    %cst_150 = arith.constant dense<0.000000e+00> : vector<8x8xf32>
    %358 = tpu.matmul %354, %340, %cst_150 {dimension_numbers = #tpu.dot_dimension_numbers<[1], [0], [0], [1], [0, 0, 1, 1], [], []>} : vector<8x8xf32>, vector<8x8xf32>, vector<8x8xf32> -> vector<8x8xf32>
    %359 = tpu.concatenate %295, %316, %337, %358 in 1 : vector<8x8xf32>, vector<8x8xf32>, vector<8x8xf32>, vector<8x8xf32> -> vector<8x32xf32>
    %c0_151 = arith.constant 0 : index
    %c0_152 = arith.constant 0 : index
    %360 = vector.load %arg27[%c0_151, %c0_152] : memref<32x32xf32, #tpu.memory_space<vmem>>, vector<32x32xf32>
    %cst_153 = arith.constant dense<0.000000e+00> : vector<8x32xf32>
    %361 = tpu.matmul %359, %360, %cst_153 {dimension_numbers = #tpu.dot_dimension_numbers<[1], [0], [0], [1], [0, 0, 1, 1], [], []>} : vector<8x32xf32>, vector<32x32xf32>, vector<8x32xf32> -> vector<8x32xf32>
    %c0_154 = arith.constant 0 : index
    %c0_155 = arith.constant 0 : index
    %362 = vector.load %arg28[%c0_154, %c0_155] : memref<1x32xf32, #tpu.memory_space<vmem>>, vector<1x32xf32>
    %363 = vector.broadcast %362 : vector<1x32xf32> to vector<8x32xf32>
    %364 = arith.addf %361, %363 : vector<8x32xf32>
    %365 = arith.addf %262, %364 : vector<8x32xf32>
    %c0_156 = arith.constant 0 : index
    %c0_157 = arith.constant 0 : index
    %366 = vector.load %arg29[%c0_156, %c0_157] : memref<1x32xf32, #tpu.memory_space<vmem>>, vector<1x32xf32>
    %c0_158 = arith.constant 0 : index
    %c0_159 = arith.constant 0 : index
    %367 = vector.load %arg30[%c0_158, %c0_159] : memref<1x32xf32, #tpu.memory_space<vmem>>, vector<1x32xf32>
    %cst_160 = arith.constant dense<0.000000e+00> : vector<8xf32>
    %368 = vector.multi_reduction <add>, %365, %cst_160 [1] : vector<8x32xf32> to vector<8xf32>
    %369 = vector.shape_cast %368 : vector<8xf32> to vector<8x1xf32>
    %cst_161 = arith.constant 3.200000e+01 : f32
    %370 = vector.broadcast %cst_161 : f32 to vector<8x1xf32>
    %371 = arith.divf %369, %370 : vector<8x1xf32>
    %372 = vector.broadcast %371 : vector<8x1xf32> to vector<8x32xf32>
    %373 = arith.subf %365, %372 : vector<8x32xf32>
    %374 = arith.mulf %373, %373 : vector<8x32xf32>
    %cst_162 = arith.constant dense<0.000000e+00> : vector<8xf32>
    %375 = vector.multi_reduction <add>, %374, %cst_162 [1] : vector<8x32xf32> to vector<8xf32>
    %376 = vector.shape_cast %375 : vector<8xf32> to vector<8x1xf32>
    %cst_163 = arith.constant 3.200000e+01 : f32
    %377 = vector.broadcast %cst_163 : f32 to vector<8x1xf32>
    %378 = arith.divf %376, %377 : vector<8x1xf32>
    %379 = vector.broadcast %371 : vector<8x1xf32> to vector<8x32xf32>
    %380 = arith.subf %365, %379 : vector<8x32xf32>
    %cst_164 = arith.constant 9.99999974E-6 : f32
    %381 = vector.broadcast %cst_164 : f32 to vector<8x1xf32>
    %382 = arith.addf %378, %381 : vector<8x1xf32>
    %383 = math.rsqrt %382 : vector<8x1xf32>
    %384 = vector.broadcast %383 : vector<8x1xf32> to vector<8x32xf32>
    %385 = arith.mulf %380, %384 : vector<8x32xf32>
    %386 = vector.broadcast %366 : vector<1x32xf32> to vector<8x32xf32>
    %387 = arith.mulf %385, %386 : vector<8x32xf32>
    %388 = vector.broadcast %367 : vector<1x32xf32> to vector<8x32xf32>
    %389 = arith.addf %387, %388 : vector<8x32xf32>
    %c0_165 = arith.constant 0 : index
    %c0_166 = arith.constant 0 : index
    %390 = vector.load %arg31[%c0_165, %c0_166] : memref<32x64xf32, #tpu.memory_space<vmem>>, vector<32x64xf32>
    %cst_167 = arith.constant dense<0.000000e+00> : vector<8x64xf32>
    %391 = tpu.matmul %389, %390, %cst_167 {dimension_numbers = #tpu.dot_dimension_numbers<[1], [0], [0], [1], [0, 0, 1, 1], [], []>} : vector<8x32xf32>, vector<32x64xf32>, vector<8x64xf32> -> vector<8x64xf32>
    %c0_168 = arith.constant 0 : index
    %c0_169 = arith.constant 0 : index
    %392 = vector.load %arg32[%c0_168, %c0_169] : memref<1x64xf32, #tpu.memory_space<vmem>>, vector<1x64xf32>
    %393 = vector.broadcast %392 : vector<1x64xf32> to vector<8x64xf32>
    %394 = arith.addf %391, %393 : vector<8x64xf32>
    %cst_170 = arith.constant 0.000000e+00 : f32
    %395 = vector.broadcast %cst_170 : f32 to vector<8x64xf32>
    %396 = arith.maximumf %394, %395 : vector<8x64xf32>
    %c0_171 = arith.constant 0 : index
    %c0_172 = arith.constant 0 : index
    %397 = vector.load %arg33[%c0_171, %c0_172] : memref<64x32xf32, #tpu.memory_space<vmem>>, vector<64x32xf32>
    %cst_173 = arith.constant dense<0.000000e+00> : vector<8x32xf32>
    %398 = tpu.matmul %396, %397, %cst_173 {dimension_numbers = #tpu.dot_dimension_numbers<[1], [0], [0], [1], [0, 0, 1, 1], [], []>} : vector<8x64xf32>, vector<64x32xf32>, vector<8x32xf32> -> vector<8x32xf32>
    %c0_174 = arith.constant 0 : index
    %c0_175 = arith.constant 0 : index
    %399 = vector.load %arg34[%c0_174, %c0_175] : memref<1x32xf32, #tpu.memory_space<vmem>>, vector<1x32xf32>
    %400 = vector.broadcast %399 : vector<1x32xf32> to vector<8x32xf32>
    %401 = arith.addf %398, %400 : vector<8x32xf32>
    %402 = arith.addf %389, %401 : vector<8x32xf32>
    %c0_176 = arith.constant 0 : index
    %c0_177 = arith.constant 0 : index
    %403 = vector.load %arg35[%c0_176, %c0_177] : memref<1x32xf32, #tpu.memory_space<vmem>>, vector<1x32xf32>
    %c0_178 = arith.constant 0 : index
    %c0_179 = arith.constant 0 : index
    %404 = vector.load %arg36[%c0_178, %c0_179] : memref<1x32xf32, #tpu.memory_space<vmem>>, vector<1x32xf32>
    %cst_180 = arith.constant dense<0.000000e+00> : vector<8xf32>
    %405 = vector.multi_reduction <add>, %402, %cst_180 [1] : vector<8x32xf32> to vector<8xf32>
    %406 = vector.shape_cast %405 : vector<8xf32> to vector<8x1xf32>
    %cst_181 = arith.constant 3.200000e+01 : f32
    %407 = vector.broadcast %cst_181 : f32 to vector<8x1xf32>
    %408 = arith.divf %406, %407 : vector<8x1xf32>
    %409 = vector.broadcast %408 : vector<8x1xf32> to vector<8x32xf32>
    %410 = arith.subf %402, %409 : vector<8x32xf32>
    %411 = arith.mulf %410, %410 : vector<8x32xf32>
    %cst_182 = arith.constant dense<0.000000e+00> : vector<8xf32>
    %412 = vector.multi_reduction <add>, %411, %cst_182 [1] : vector<8x32xf32> to vector<8xf32>
    %413 = vector.shape_cast %412 : vector<8xf32> to vector<8x1xf32>
    %cst_183 = arith.constant 3.200000e+01 : f32
    %414 = vector.broadcast %cst_183 : f32 to vector<8x1xf32>
    %415 = arith.divf %413, %414 : vector<8x1xf32>
    %416 = vector.broadcast %408 : vector<8x1xf32> to vector<8x32xf32>
    %417 = arith.subf %402, %416 : vector<8x32xf32>
    %cst_184 = arith.constant 9.99999974E-6 : f32
    %418 = vector.broadcast %cst_184 : f32 to vector<8x1xf32>
    %419 = arith.addf %415, %418 : vector<8x1xf32>
    %420 = math.rsqrt %419 : vector<8x1xf32>
    %421 = vector.broadcast %420 : vector<8x1xf32> to vector<8x32xf32>
    %422 = arith.mulf %417, %421 : vector<8x32xf32>
    %423 = vector.broadcast %403 : vector<1x32xf32> to vector<8x32xf32>
    %424 = arith.mulf %422, %423 : vector<8x32xf32>
    %425 = vector.broadcast %404 : vector<1x32xf32> to vector<8x32xf32>
    %426 = arith.addf %424, %425 : vector<8x32xf32>
    %c0_185 = arith.constant 0 : index
    %c0_186 = arith.constant 0 : index
    %427 = vector.load %arg37[%c0_185, %c0_186] : memref<32x20xf32, #tpu.memory_space<vmem>>, vector<32x20xf32>
    %cst_187 = arith.constant dense<0.000000e+00> : vector<8x20xf32>
    %428 = tpu.matmul %426, %427, %cst_187 {dimension_numbers = #tpu.dot_dimension_numbers<[1], [0], [0], [1], [0, 0, 1, 1], [], []>} : vector<8x32xf32>, vector<32x20xf32>, vector<8x20xf32> -> vector<8x20xf32>
    %c0_188 = arith.constant 0 : index
    %c0_189 = arith.constant 0 : index
    %429 = vector.load %arg38[%c0_188, %c0_189] : memref<1x20xf32, #tpu.memory_space<vmem>>, vector<1x20xf32>
    %430 = vector.broadcast %429 : vector<1x20xf32> to vector<8x20xf32>
    %431 = arith.addf %428, %430 : vector<8x20xf32>
    %c0_190 = arith.constant 0 : index
    %c0_191 = arith.constant 0 : index
    %c0_192 = arith.constant 0 : index
    %432 = vector.load %arg39[%c0_190, %c0_191, %c0_192] : memref<1x8x20xf32, #tpu.memory_space<vmem>>, vector<1x8x20xf32>
    %433 = vector.shape_cast %432 : vector<1x8x20xf32> to vector<8x20xf32>
    %434 = vector.shape_cast %431 : vector<8x20xf32> to vector<1x8x20xf32>
    tpu.vector_store %arg39[%c0_190, %c0_191, %c0_192], %434 {strides = array<i32>} : memref<1x8x20xf32, #tpu.memory_space<vmem>>, vector<1x8x20xf32>,
    return
  }
  func.func @transform_0(%arg0: i32) -> (i32, i32, i32) {
    %c0_i32 = arith.constant 0 : i32
    %c0_i32_0 = arith.constant 0 : i32
    %c0_i32_1 = arith.constant 0 : i32
    return %arg0, %c0_i32, %c0_i32_0 : i32, i32, i32
  }
  func.func @transform_1(%arg0: i32) -> (i32, i32, i32) {
    %c0_i32 = arith.constant 0 : i32
    %c0_i32_0 = arith.constant 0 : i32
    %c0_i32_1 = arith.constant 0 : i32
    return %arg0, %c0_i32, %c0_i32_0 : i32, i32, i32
  }
  func.func @transform_2(%arg0: i32) -> (i32, i32, i32) {
    %c0_i32 = arith.constant 0 : i32
    %c0_i32_0 = arith.constant 0 : i32
    %c0_i32_1 = arith.constant 0 : i32
    return %arg0, %c0_i32, %c0_i32_0 : i32, i32, i32
  }
  func.func @transform_3(%arg0: i32) -> (i32, i32, i32) {
    %c0_i32 = arith.constant 0 : i32
    %c0_i32_0 = arith.constant 0 : i32
    %c0_i32_1 = arith.constant 0 : i32
    return %arg0, %c0_i32, %c0_i32_0 : i32, i32, i32
  }
  func.func @transform_4(%arg0: i32) -> (i32, i32) {
    %c0_i32 = arith.constant 0 : i32
    %c0_i32_0 = arith.constant 0 : i32
    %c0_i32_1 = arith.constant 0 : i32
    return %c0_i32, %c0_i32_0 : i32, i32
  }
  func.func @transform_5(%arg0: i32) -> (i32, i32) {
    %c0_i32 = arith.constant 0 : i32
    %c0_i32_0 = arith.constant 0 : i32
    %c0_i32_1 = arith.constant 0 : i32
    return %c0_i32, %c0_i32_0 : i32, i32
  }
  func.func @transform_6(%arg0: i32) -> (i32, i32) {
    %c0_i32 = arith.constant 0 : i32
    %c0_i32_0 = arith.constant 0 : i32
    %c0_i32_1 = arith.constant 0 : i32
    return %c0_i32, %c0_i32_0 : i32, i32
  }
  func.func @transform_7(%arg0: i32) -> (i32, i32) {
    %c0_i32 = arith.constant 0 : i32
    %c0_i32_0 = arith.constant 0 : i32
    %c0_i32_1 = arith.constant 0 : i32
    return %c0_i32, %c0_i32_0 : i32, i32
  }
  func.func @transform_8(%arg0: i32) -> (i32, i32) {
    %c0_i32 = arith.constant 0 : i32
    %c0_i32_0 = arith.constant 0 : i32
    %c0_i32_1 = arith.constant 0 : i32
    return %c0_i32, %c0_i32_0 : i32, i32
  }
  func.func @transform_9(%arg0: i32) -> (i32, i32) {
    %c0_i32 = arith.constant 0 : i32
    %c0_i32_0 = arith.constant 0 : i32
    %c0_i32_1 = arith.constant 0 : i32
    return %c0_i32, %c0_i32_0 : i32, i32
  }
  func.func @transform_10(%arg0: i32) -> (i32, i32) {
    %c0_i32 = arith.constant 0 : i32
    %c0_i32_0 = arith.constant 0 : i32
    %c0_i32_1 = arith.constant 0 : i32
    return %c0_i32, %c0_i32_0 : i32, i32
  }
  func.func @transform_11(%arg0: i32) -> (i32, i32) {
    %c0_i32 = arith.constant 0 : i32
    %c0_i32_0 = arith.constant 0 : i32
    %c0_i32_1 = arith.constant 0 : i32
    return %c0_i32, %c0_i32_0 : i32, i32
  }
  func.func @transform_12(%arg0: i32) -> (i32, i32) {
    %c0_i32 = arith.constant 0 : i32
    %c0_i32_0 = arith.constant 0 : i32
    %c0_i32_1 = arith.constant 0 : i32
    return %c0_i32, %c0_i32_0 : i32, i32
  }
  func.func @transform_13(%arg0: i32) -> (i32, i32) {
    %c0_i32 = arith.constant 0 : i32
    %c0_i32_0 = arith.constant 0 : i32
    %c0_i32_1 = arith.constant 0 : i32
    return %c0_i32, %c0_i32_0 : i32, i32
  }
  func.func @transform_14(%arg0: i32) -> (i32, i32) {
    %c0_i32 = arith.constant 0 : i32
    %c0_i32_0 = arith.constant 0 : i32
    %c0_i32_1 = arith.constant 0 : i32
    return %c0_i32, %c0_i32_0 : i32, i32
  }
  func.func @transform_15(%arg0: i32) -> (i32, i32) {
    %c0_i32 = arith.constant 0 : i32
    %c0_i32_0 = arith.constant 0 : i32
    %c0_i32_1 = arith.constant 0 : i32
    return %c0_i32, %c0_i32_0 : i32, i32
  }
  func.func @transform_16(%arg0: i32) -> (i32, i32) {
    %c0_i32 = arith.constant 0 : i32
    %c0_i32_0 = arith.constant 0 : i32
    %c0_i32_1 = arith.constant 0 : i32
    return %c0_i32, %c0_i32_0 : i32, i32
  }
  func.func @transform_17(%arg0: i32) -> (i32, i32) {
    %c0_i32 = arith.constant 0 : i32
    %c0_i32_0 = arith.constant 0 : i32
    %c0_i32_1 = arith.constant 0 : i32
    return %c0_i32, %c0_i32_0 : i32, i32
  }
  func.func @transform_18(%arg0: i32) -> (i32, i32) {
    %c0_i32 = arith.constant 0 : i32
    %c0_i32_0 = arith.constant 0 : i32
    %c0_i32_1 = arith.constant 0 : i32
    return %c0_i32, %c0_i32_0 : i32, i32
  }
  func.func @transform_19(%arg0: i32) -> (i32, i32) {
    %c0_i32 = arith.constant 0 : i32
    %c0_i32_0 = arith.constant 0 : i32
    %c0_i32_1 = arith.constant 0 : i32
    return %c0_i32, %c0_i32_0 : i32, i32
  }
  func.func @transform_20(%arg0: i32) -> (i32, i32) {
    %c0_i32 = arith.constant 0 : i32
    %c0_i32_0 = arith.constant 0 : i32
    %c0_i32_1 = arith.constant 0 : i32
    return %c0_i32, %c0_i32_0 : i32, i32
  }
  func.func @transform_21(%arg0: i32) -> (i32, i32) {
    %c0_i32 = arith.constant 0 : i32
    %c0_i32_0 = arith.constant 0 : i32
    %c0_i32_1 = arith.constant 0 : i32
    return %c0_i32, %c0_i32_0 : i32, i32
  }
  func.func @transform_22(%arg0: i32) -> (i32, i32) {
    %c0_i32 = arith.constant 0 : i32
    %c0_i32_0 = arith.constant 0 : i32
    %c0_i32_1 = arith.constant 0 : i32
    return %c0_i32, %c0_i32_0 : i32, i32
  }
  func.func @transform_23(%arg0: i32) -> (i32, i32) {
    %c0_i32 = arith.constant 0 : i32
    %c0_i32_0 = arith.constant 0 : i32
    %c0_i32_1 = arith.constant 0 : i32
    return %c0_i32, %c0_i32_0 : i32, i32
  }
  func.func @transform_24(%arg0: i32) -> (i32, i32) {
    %c0_i32 = arith.constant 0 : i32
    %c0_i32_0 = arith.constant 0 : i32
    %c0_i32_1 = arith.constant 0 : i32
    return %c0_i32, %c0_i32_0 : i32, i32
  }
  func.func @transform_25(%arg0: i32) -> (i32, i32) {
    %c0_i32 = arith.constant 0 : i32
    %c0_i32_0 = arith.constant 0 : i32
    %c0_i32_1 = arith.constant 0 : i32
    return %c0_i32, %c0_i32_0 : i32, i32
  }
  func.func @transform_26(%arg0: i32) -> (i32, i32) {
    %c0_i32 = arith.constant 0 : i32
    %c0_i32_0 = arith.constant 0 : i32
    %c0_i32_1 = arith.constant 0 : i32
    return %c0_i32, %c0_i32_0 : i32, i32
  }
  func.func @transform_27(%arg0: i32) -> (i32, i32) {
    %c0_i32 = arith.constant 0 : i32
    %c0_i32_0 = arith.constant 0 : i32
    %c0_i32_1 = arith.constant 0 : i32
    return %c0_i32, %c0_i32_0 : i32, i32
  }
  func.func @transform_28(%arg0: i32) -> (i32, i32) {
    %c0_i32 = arith.constant 0 : i32
    %c0_i32_0 = arith.constant 0 : i32
    %c0_i32_1 = arith.constant 0 : i32
    return %c0_i32, %c0_i32_0 : i32, i32
  }
  func.func @transform_29(%arg0: i32) -> (i32, i32) {
    %c0_i32 = arith.constant 0 : i32
    %c0_i32_0 = arith.constant 0 : i32
    %c0_i32_1 = arith.constant 0 : i32
    return %c0_i32, %c0_i32_0 : i32, i32
  }
  func.func @transform_30(%arg0: i32) -> (i32, i32) {
    %c0_i32 = arith.constant 0 : i32
    %c0_i32_0 = arith.constant 0 : i32
    %c0_i32_1 = arith.constant 0 : i32
    return %c0_i32, %c0_i32_0 : i32, i32
  }
  func.func @transform_31(%arg0: i32) -> (i32, i32) {
    %c0_i32 = arith.constant 0 : i32
    %c0_i32_0 = arith.constant 0 : i32
    %c0_i32_1 = arith.constant 0 : i32
    return %c0_i32, %c0_i32_0 : i32, i32
  }
  func.func @transform_32(%arg0: i32) -> (i32, i32) {
    %c0_i32 = arith.constant 0 : i32
    %c0_i32_0 = arith.constant 0 : i32
    %c0_i32_1 = arith.constant 0 : i32
    return %c0_i32, %c0_i32_0 : i32, i32
  }
  func.func @transform_33(%arg0: i32) -> (i32, i32) {
    %c0_i32 = arith.constant 0 : i32
    %c0_i32_0 = arith.constant 0 : i32
    %c0_i32_1 = arith.constant 0 : i32
    return %c0_i32, %c0_i32_0 : i32, i32
  }
  func.func @transform_34(%arg0: i32) -> (i32, i32) {
    %c0_i32 = arith.constant 0 : i32
    %c0_i32_0 = arith.constant 0 : i32
    %c0_i32_1 = arith.constant 0 : i32
    return %c0_i32, %c0_i32_0 : i32, i32
  }
  func.func @transform_35(%arg0: i32) -> (i32, i32) {
    %c0_i32 = arith.constant 0 : i32
    %c0_i32_0 = arith.constant 0 : i32
    %c0_i32_1 = arith.constant 0 : i32
    return %c0_i32, %c0_i32_0 : i32, i32
  }
  func.func @transform_36(%arg0: i32) -> (i32, i32) {
    %c0_i32 = arith.constant 0 : i32
    %c0_i32_0 = arith.constant 0 : i32
    %c0_i32_1 = arith.constant 0 : i32
    return %c0_i32, %c0_i32_0 : i32, i32
  }
  func.func @transform_37(%arg0: i32) -> (i32, i32) {
    %c0_i32 = arith.constant 0 : i32
    %c0_i32_0 = arith.constant 0 : i32
    %c0_i32_1 = arith.constant 0 : i32
    return %c0_i32, %c0_i32_0 : i32, i32
  }
  func.func @transform_38(%arg0: i32) -> (i32, i32, i32) {
    %c0_i32 = arith.constant 0 : i32
    %c0_i32_0 = arith.constant 0 : i32
    %c0_i32_1 = arith.constant 0 : i32
    return %arg0, %c0_i32, %c0_i32_0 : i32, i32, i32
  }
  func.func @transform_39(%arg0: i32) -> (i32, i32, i32, i32) {
    %c0_i32 = arith.constant 0 : i32
    %c0_i32_0 = arith.constant 0 : i32
    %c0_i32_1 = arith.constant 0 : i32
    %c0_i32_2 = arith.constant 0 : i32
    return %arg0, %c0_i32, %c0_i32_0, %c0_i32_1 : i32, i32, i32, i32
  }
}

</mosaic_0001>

<bundles_post_ra>
// kernel: seq2seq_forward.1
= control target key start
LH: loop header
LB: loop body
LE: loop exit
PB: predicated region body
PF: predicated region fallthrough
CT: control target
= control target key end

     0   :  { %s3362_s6 = smov 1   ;;  %s3363_s10 = smov 2   ;;  %s4064_s0 = inlined_call_operand.smem [shape: u32[40], index: -1, kind: input, shape index: {}] }
   0x1   :  { %s3425_s5 = sld [smem:[%s4064_s0]]   ;;  %s3364_s14 = smov 3  }
   0x2   :  { %s3430_s9 = sld [smem:[%s4064_s0 + %s3362_s6]]   ;;  %s3365_s18 = smov 4  }
   0x3   :  { %s3435_s13 = sld [smem:[%s4064_s0 + %s3363_s10]]   ;;  %s3366_s22 = smov 5  }
   0x4   :  { %s3440_s17 = sld [smem:[%s4064_s0 + %s3364_s14]]   ;;  %s3367_s26 = smov 6  }
   0x5   :  { %s3445_s21 = sld [smem:[%s4064_s0 + %s3365_s18]]   ;;  %s3368_s30 = smov 7  }
   0x6   :  { %s3450_s25 = sld [smem:[%s4064_s0 + %s3366_s22]]   ;;  %s3369_s4 = smov 8  }
   0x7   :  { %4100 = sst [smem:[#allocation8_spill]] %s3425_s5  ;;  %s3370_s10 = smov 9  }
   0x8   :  { %4101 = sst [smem:[#allocation9_spill]] %s3430_s9  ;;  %s3371_s15 = smov 10  }
   0x9   :  { %4102 = sst [smem:[#allocation10_spill]] %s3435_s13  ;;  %s3372_s20 = smov 11  }
   0xa   :  { %4103 = sst [smem:[#allocation11_spill]] %s3440_s17  ;;  %s3374_s1 = smov 13  }
   0xb   :  { %4104 = sst [smem:[#allocation12_spill]] %s3445_s21  ;;  %s3375_s7 = smov 14  }
   0xc   :  { %s3455_s29 = sld [smem:[%s4064_s0 + %s3367_s26]]   ;;  %s3373_s26 = smov 12  }
   0xd   :  { %s3460_s3 = sld [smem:[%s4064_s0 + %s3368_s30]]   ;;  %s3377_s22 = smov 16  }
   0xe   :  { %s3465_s8 = sld [smem:[%s4064_s0 + %s3369_s4]]   ;;  %s3378_s28 = smov 17  }
   0xf   :  { %s3470_s14 = sld [smem:[%s4064_s0 + %s3370_s10]]  }
  0x10   :  { %s3475_s19 = sld [smem:[%s4064_s0 + %s3371_s15]]   ;;  %s3376_s15 = smov 15  }
  0x11   :  { %s3480_s24 = sld [smem:[%s4064_s0 + %s3372_s20]]  }
  0x12   :  { %s3485_s30 = sld [smem:[%s4064_s0 + %s3373_s26]]  }
  0x13   :  { %4105 = sst [smem:[#allocation13_spill]] %s3460_s3 }
  0x14   :  { %4106 = sst [smem:[#allocation14_spill]] %s3465_s8 }
  0x15   :  { %4107 = sst [smem:[#allocation15_spill]] %s3470_s14 }
  0x16   :  { %s3490_s6 = sld [smem:[%s4064_s0 + %s3374_s1]]  }
  0x17   :  { %4108 = sst [smem:[#allocation16_spill]] %s3480_s24 }
  0x18   :  { %s3495_s12 = sld [smem:[%s4064_s0 + %s3375_s7]]   ;;  %s3379_s7 = smov 18  }
  0x19   :  { %s3500_s20 = sld [smem:[%s4064_s0 + %s3376_s15]]   ;;  %s3380_s15 = smov 19  }
  0x1a   :  { %s3505_s27 = sld [smem:[%s4064_s0 + %s3377_s22]]   ;;  %s3381_s22 = smov 20  }
  0x1b   :  { %s3510_s4 = sld [smem:[%s4064_s0 + %s3378_s28]]   ;;  %s3382_s28 = smov 21  }
  0x1c   :  { %4109 = sst [smem:[#allocation17_spill]] %s3490_s6 }
  0x1d   :  { %s3525_s6 = sld [smem:[%s4064_s0 + %s3381_s22]]   ;;  %s3385_s22 = smov 24  }
  0x1e   :  { %4110 = sst [smem:[#allocation18_spill]] %s3495_s12 }
  0x1f   :  { %4111 = sst [smem:[#allocation19_spill]] %s3500_s20 }
  0x20   :  { %s3515_s12 = sld [smem:[%s4064_s0 + %s3379_s7]]   ;;  %s3383_s7 = smov 22  }
  0x21   :  { %4112 = sst [smem:[#allocation20_spill]] %s3510_s4 }
  0x22   :  { %s3520_s20 = sld [smem:[%s4064_s0 + %s3380_s15]]   ;;  %s3384_s15 = smov 23  }
  0x23   :  { %4115 = sst [smem:[#allocation23_spill]] %s3525_s6 }
  0x24   :  { %s3530_s24 = sld [smem:[%s4064_s0 + %s3382_s28]]   ;;  %s3386_s28 = smov 25  }
  0x25   :  { %s3545_s6 = sld [smem:[%s4064_s0 + %s3385_s22]]   ;;  %s3389_s22 = smov 28  }
  0x26   :  { %4113 = sst [smem:[#allocation21_spill]] %s3515_s12 }
  0x27   :  { %s3535_s12 = sld [smem:[%s4064_s0 + %s3383_s7]]   ;;  %s3387_s7 = smov 26  }
  0x28   :  { %4114 = sst [smem:[#allocation22_spill]] %s3520_s20 }
  0x29   :  { %s3540_s20 = sld [smem:[%s4064_s0 + %s3384_s15]]   ;;  %s3388_s15 = smov 27  }
  0x2a   :  { %4116 = sst [smem:[#allocation24_spill]] %s3530_s24 }
  0x2b   :  { %4119 = sst [smem:[#allocation27_spill]] %s3545_s6 }
  0x2c   :  { %s3550_s24 = sld [smem:[%s4064_s0 + %s3386_s28]]   ;;  %s3390_s28 = smov 29  }
  0x2d   :  { %4117 = sst [smem:[#allocation25_spill]] %s3535_s12 }
  0x2e   :  { %s3555_s12 = sld [smem:[%s4064_s0 + %s3387_s7]]   ;;  %s3391_s7 = smov 30  }
  0x2f   :  { %4118 = sst [smem:[#allocation26_spill]] %s3540_s20 }
  0x30   :  { %s3560_s20 = sld [smem:[%s4064_s0 + %s3388_s15]]   ;;  %s3392_s15 = smov 31  }
  0x31   :  { %s3565_s6 = sld [smem:[%s4064_s0 + %s3389_s22]]   ;;  %s3393_s22 = smov 32  }
  0x32   :  { %4120 = sst [smem:[#allocation28_spill]] %s3550_s24 }
  0x33   :  { %s3570_s24 = sld [smem:[%s4064_s0 + %s3390_s28]]   ;;  %s3394_s28 = smov 33  }
  0x34   :  { %4121 = sst [smem:[#allocation29_spill]] %s3555_s12 }
  0x35   :  { %s3575_s12 = sld [smem:[%s4064_s0 + %s3391_s7]]   ;;  %s3395_s7 = smov 34  }
  0x36   :  { %4122 = sst [smem:[#allocation30_spill]] %s3560_s20 }
  0x37   :  { %4123 = sst [smem:[#allocation31_spill]] %s3565_s6 }
  0x38   :  { %s3580_s20 = sld [smem:[%s4064_s0 + %s3392_s15]]   ;;  %s3396_s15 = smov 35  }
  0x39   :  { %4124 = sst [smem:[#allocation32_spill]] %s3570_s24 }
  0x3a   :  { %s3585_s6 = sld [smem:[%s4064_s0 + %s3393_s22]]   ;;  %s3397_s22 = smov 36  }
  0x3b   :  { %4125 = sst [smem:[#allocation33_spill]] %s3575_s12 }
  0x3c   :  { %s3590_s24 = sld [smem:[%s4064_s0 + %s3394_s28]]   ;;  %s3398_s28 = smov 37  }
  0x3d   :  { %s3595_s12 = sld [smem:[%s4064_s0 + %s3395_s7]]   ;;  %s3399_s7 = smov 38  }
  0x3e   :  { %4126 = sst [smem:[#allocation34_spill]] %s3580_s20 }
  0x3f   :  { %s3600_s20 = sld [smem:[%s4064_s0 + %s3396_s15]]   ;;  %s3400_s15 = smov 39  }
  0x40   :  { %4127 = sst [smem:[#allocation35_spill]] %s3585_s6 }
  0x41   :  { %s3605_s6 = sld [smem:[%s4064_s0 + %s3397_s22]]  }
  0x42   :  { %4128 = sst [smem:[#allocation36_spill]] %s3590_s24 }
  0x43   :  { %4129 = sst [smem:[#allocation37_spill]] %s3595_s12 }
  0x44   :  { %s3610_s24 = sld [smem:[%s4064_s0 + %s3398_s28]]  }
  0x45   :  { %4130 = sst [smem:[#allocation38_spill]] %s3600_s20 }
  0x46   :  { %s3615_s12 = sld [smem:[%s4064_s0 + %s3399_s7]]  }
  0x47   :  { %4131 = sst [smem:[#allocation39_spill]] %s3605_s6 }
  0x48   :  { %s3620_s20 = sld [smem:[%s4064_s0 + %s3400_s15]]  }
  0x49   :  { %85 = vsyncpa [#allocation3], 0 }
  0x4a   :  { %87 = vsyncpa [#allocation3 + $0x1], 0 }
  0x4b   :  { %88 = vsyncpa [#allocation5], 0 }
  0x4c   :  { %90 = vsyncpa [#allocation5 + $0x1], 0  ;;  %s3622_s22 = smov 0   ;;  %s3624_s23 = smov 0  }
  0x4d   :  { %s3626_s26 = smov 0   ;;  %s3628_s28 = smov 0  }
  0x4e LB: > { %s4132_s6 = sld [smem:[#allocation39_spill]]  ;;  %s3643_s0 = sadd.s32 4294967295, %s3360_s28   ;;  %s3352_s23 = sphi %s3624_s23, %s4183_s23   ;;  %s3348_s22 = sphi %s3622_s22, %s4182_s22   ;;  %s3360_s28 = sphi %s3628_s28, %s4185_s28   ;;  %s3356_s26 = sphi %s3626_s26, %s4184_s26  }
  0x4f   : > { %s4133_s21 = sld [smem:[#allocation12_spill]]  ;;  %s3015_s1 = sadd.s32 4294967294, %s3360_s28  }
  0x50   : > { %s3647_s2 = sadd.s32 1, %s3360_s28   ;;  %s921_s7 = sadd.s32 1, %s3356_s26 }
  0x51   : > { %s918_s10 = ssub.s32 %s3360_s28, %s3647_s2  ;;  %p931_p0 = scmp.ne.s32.totalorder %s3356_s26, %s3352_s23 }
  0x52   : > { %p919_p1 = scmp.eq.s32.totalorder %s918_s10, 0  ;;  %p932_p2 = scmp.eq.s32.totalorder %s3643_s0, 1 }
  0x53   : > { %p937_p3 = scmp.ne.s32.totalorder %s3352_s23, %s3348_s22  ;;  %p938_p4 = scmp.eq.s32.totalorder %s3015_s1, 1 }
  0x54   : > { %s3658_s11 = scalar_select %p919_p1, %s3356_s26, %s921_s7  }
  0x55   : > { %p3660_p5 = por %p932_p2, %p931_p0  ;;  %p3664_p6 = por %p938_p4, %p937_p3 }
  0x56   : > { %4134 = sst [smem:[#allocation40_spill]] %s3658_s11  ;;  %p3018_p7 = scmp.ge.s32.totalorder %s3360_s28, 1 }
  0x57   : > { %p1111_p8 = scmp.lt.s32.totalorder %s3360_s28, 3 }
  0x59   : > { %p1112_p9 = pnand %p3018_p7, %p1111_p8 }
  0x5a   : > { %s4137_s13 = sld [smem:[#allocation10_spill]] (!%p1112_p9)  ;;  %p1222_p10 = scmp.lt.s32.totalorder (!%p1112_p9), %s3643_s0, 1 }
  0x5b   : > { %1115 = sbr.rel (%p1112_p9) target bundleno = 4445 (0x115d), region = 172  ;;  %s4138_s5 = sld [smem:[#allocation8_spill]] (!%p1112_p9) }
  0x5c   : > { %s4072_s11 = smov (!%p1112_p9), 112   ;;  %s4139_s9 = sld [smem:[#allocation9_spill]] (!%p1112_p9) }
  0x5d   : > { %s4140_s4 = sld [smem:[#allocation20_spill]] (!%p1112_p9) }
  0x5e   : > { %s4141_s3 = sld [smem:[#allocation13_spill]] (!%p1112_p9) }
  0x5f   : > { %s4142_s17 = sld [smem:[#allocation11_spill]] (!%p1112_p9) }
  0x60   : > { %v1242_v0 = vld [vmem:[%s4133_s21 + $0x18] sm:$0xff]  ;;  %v1241_v1 = vld [vmem:[%s4133_s21 + $0x10] sm:$0xff]  ;;  %v1240_v2 = vld [vmem:[%s4133_s21 + $0x8] sm:$0xff]  ;;  %s1223_s18 = scalar_select %p1222_p10, %s3643_s0, 1  ;;  %vm1247_vm0 = vcmask 261120   ;;  %vm1274_vm1 = vcmask 64512  }
  0x61   : > { %1263 = vmatpush.msra.mxu0 %v1242_v0  ;;  %v1239_v3 = vld [vmem:[%s4133_s21] sm:$0xff]  ;;  %s4088_s21 = smov 120   ;;  %s4148_s8 = sld [smem:[#allocation14_spill]] }
  0x62   : > { %s3676_s1 = sshll.u32 %s1223_s18, 3  ;;  %s3679_s7 = scalar_lea.vmem %s4137_s13, %s1223_s18  ;;  %v3183_v5 = vld [vmem:[%s3450_s25] ss:$0 sm:$0xff] }
  0x63   : > { %1264 = vmatpush.msra.mxu0 %v1241_v1  ;;  %s1225_s10 = scalar_lea.vmem %s4138_s5, %s3676_s1  ;;  %s4084_s18 = smov 96   ;;  %v3182_v15 = vld [vmem:[%s3679_s7] ss:$0 sm:$0xff] }
  0x64   : > { %v3683_v4 = vld [vmem:[%s1225_s10] sm:$0xff]  ;;  %s4077_s10 = smov 72   ;;  %s4079_s5 = smov 80  }
  0x65   : > { %1265 = vmatpush.msra.mxu0 %v1240_v2  ;;  %s4087_s13 = smov 88   ;;  %s4149_s14 = sld [smem:[#allocation15_spill]] }
  0x67   : > { %1266 = vmatpush.msra.mxu0 %v1239_v3 }
  0x68   : > { %3024 = vmatmul.msk.f32.vlgmr.msra.gmra.mxu0 %vm1247_vm0, %v3683_v4 }
  0xe5   : > { %v1268_v6 = vpop.f32.mrf.mxu0 }
  0xe6   : > { %v3688_v7 = vadd.f32 %v3183_v5, %v1268_v6 }
  0xe8   : > { %1434 = vrot.lane.b32.xlu2 %v3688_v7, %s4072_s11  ;;  %1354 = vrot.lane.b32.xlu1 %v3688_v7, %s4088_s21  ;;  %s4074_s11 = smov 104  }
  0xe9   : > { %1272 = vrot.lane.b32.xlu0 %v3688_v7, %s4084_s18 }
  0xf0   : > { %1516 = vrot.lane.b32.xlu2 %v3688_v7, %s4077_s10  ;;  %1436 = vrot.lane.b32.xlu1 %v3688_v7, %s4079_s5  ;;  %s4083_s10 = smov 64   ;;  %s4081_s5 = smov 48  }
  0xf1   : > { %1356 = vrot.lane.b32.xlu0 %v3688_v7, %s4087_s13 }
  0xf9   : > { %1514 = vrot.lane.b32.xlu0 %v3688_v7, %s4074_s11  ;;  %s4076_s11 = smov 56  }
 0x142   : > { %v1435_v8 = vpop.permute.xlu2 %1434 }
 0x14a   : > { %v1517_v12 = vpop.permute.xlu2 %1516 }
 0x15a   : > { %v1355_v9 = vpop.permute.xlu1 %1354 }
 0x15b   : > { %v1273_v10 = vpop.permute.xlu0 %1272 }
 0x15c   : > { %3025 = vmatpush.xpose.msk.msra.mxu1 %vm1274_vm1, %v1273_v10 }
 0x15f   : > { %3026 = vmatmul.msk.f32.vlgmr.msra.gmra.mxu1 %vm1274_vm1, %v3688_v7 }
 0x162   : > { %v1437_v11 = vpop.permute.xlu1 %1436 }
 0x163   : > { %v1357_v13 = vpop.permute.xlu0 %1356  ;;  %3031 = vmatpush.xpose.msk.msrb.mxu1 %vm1274_vm1, %v1437_v11 }
 0x164   : > { %3028 = vmatpush.xpose.msk.msra.mxu3 %vm1274_vm1, %v1357_v13 }
 0x167   : > { %3034 = vmatpush.xpose.msk.msra.mxu1 %vm1274_vm1, %v1517_v12  ;;  %3029 = vmatmul.msk.f32.vlgmr.msra.gmra.mxu3 %vm1274_vm1, %v1355_v9 }
 0x168   : > { %3032 = vmatmul.msk.f32.vlgmr.msrb.gmra.mxu1 %vm1274_vm1, %v1435_v8 }
 0x16b   : > { %v1515_v14 = vpop.permute.xlu0 %1514 }
 0x170   : > { %3035 = vmatmul.msk.f32.vlgmr.msra.gmra.mxu1 %vm1274_vm1, %v1515_v14 }
 0x1dc   : > { %v1296_v16 = vpop.f32.mrf.mxu1 }
 0x1dd   : > { %v1299_v17 = vmul.f32 0.35355338, %v1296_v16 }
 0x1df   : > { %v1303_v18 = vadd.f32 %v3182_v15, %v1299_v17 }
 0x1e1   : > { %v1304_v19 = vsel %vm1274_vm1, %v1303_v18, -inf }
 0x1e2   : > { %1305 = vmax.xlane.f32.xlu1 %v1304_v19 }
 0x1e5   : > { %v1459_v20 = vpop.f32.mrf.mxu1 }
 0x1e6   : > { %v1462_v21 = vmul.f32 0.35355338, %v1459_v20 }
 0x1e8   : > { %v1463_v22 = vadd.f32 %v3182_v15, %v1462_v21 }
 0x1ea   : > { %v1464_v23 = vsel %vm1274_vm1, %v1463_v22, -inf  ;;  %v1379_v24 = vpop.f32.mrf.mxu3 }
 0x1eb   : > { %1465 = vmax.xlane.f32.xlu0 %v1464_v23  ;;  %v1382_v25 = vmul.f32 0.35355338, %v1379_v24 }
 0x1ed   : > { %v1539_v26 = vpop.f32.mrf.mxu1  ;;  %v1383_v27 = vadd.f32 %v3182_v15, %v1382_v25  ;;  %v1788_v25 = vld [vmem:[%s3505_s27 + $0x18] sm:$0xff] }
 0x1ee   : > { %v1542_v28 = vmul.f32 0.35355338, %v1539_v26 }
 0x1ef   : > { %v1384_v29 = vsel %vm1274_vm1, %v1383_v27, -inf }
 0x1f0   : > { %1385 = vmax.xlane.f32.xlu2 %v1384_v29  ;;  %v1543_v30 = vadd.f32 %v3182_v15, %v1542_v28  ;;  %v1787_v29 = vld [vmem:[%s3505_s27 + $0x10] sm:$0xff] }
 0x1f2   : > { %v1544_v31 = vsel %vm1274_vm1, %v1543_v30, -inf }
 0x1f8   : > { %1545 = vmax.xlane.f32.xlu2 %v1544_v31 }
 0x1ff   : > { %1408 = vrot.lane.b32.xlu0 %v3688_v7, %s4076_s11  ;;  %s4082_s11 = smov 40  }
 0x255   : > { %v1306_v32 = vpop.xlane.xlu1 %1305 }
 0x256   : > { %v1307_v33 = vsub.f32 %v1303_v18, %v1306_v32  ;;  %v1786_v32 = vld [vmem:[%s3505_s27 + $0x8] sm:$0xff] }
 0x258   : > { %v1308_v34 = vmul.f32 1.442695, %v1307_v33 }
 0x25a   : > { %3205 = vpow2.f32 %v1308_v34 }
 0x25e   : > { %v1466_v35 = vpop.xlane.xlu0 %1465 }
 0x25f   : > { %v1467_v36 = vsub.f32 %v1463_v22, %v1466_v35 }
 0x260   : > { %v3206_v37 = vpop.eup %3205 }
 0x261   : > { %v1468_v38 = vmul.f32 1.442695, %v1467_v36  ;;  %v1310_v39 = vsel %vm1274_vm1, %v3206_v37, 0.0 }
 0x262   : > { %1311 = vadd.xlane.f32.xlu1 %v1310_v39 }
 0x263   : > { %3207 = vpow2.f32 %v1468_v38  ;;  %v1386_v40 = vpop.xlane.xlu2 %1385 }
 0x264   : > { %v1387_v41 = vsub.f32 %v1383_v27, %v1386_v40 }
 0x266   : > { %v1388_v42 = vmul.f32 1.442695, %v1387_v41 }
 0x268   : > { %3209 = vpow2.f32 %v1388_v42 }
 0x269   : > { %v3721_v43 = vpop.eup %3207 }
 0x26a   : > { %v1470_v44 = vsel %vm1274_vm1, %v3721_v43, 0.0 }
 0x26b   : > { %1471 = vadd.xlane.f32.xlu0 %v1470_v44  ;;  %v1546_v45 = vpop.xlane.xlu2 %1545 }
 0x26c   : > { %v1547_v46 = vsub.f32 %v1543_v30, %v1546_v45 }
 0x26e   : > { %v3725_v47 = vpop.eup %3209  ;;  %v1548_v48 = vmul.f32 1.442695, %v1547_v46 }
 0x26f   : > { %v1390_v49 = vsel %vm1274_vm1, %v3725_v47, 0.0 }
 0x270   : > { %3211 = vpow2.f32 %v1548_v48  ;;  %1391 = vadd.xlane.f32.xlu2 %v1390_v49 }
 0x271   : > { %v1409_v53 = vpop.permute.xlu0 %1408 }
 0x276   : > { %v3729_v50 = vpop.eup %3211 }
 0x277   : > { %v1550_v51 = vsel %vm1274_vm1, %v3729_v50, 0.0 }
 0x278   : > { %1551 = vadd.xlane.f32.xlu1 %v1550_v51 }
 0x27f   : > { %1568 = vrot.lane.b32.xlu0 %v3688_v7, %s4082_s11  ;;  %s4092_s11 = smov 8  }
 0x288   : > { %1328 = vrot.lane.b32.xlu2 %v3688_v7, %s4083_s10  ;;  %s4090_s10 = smov 24  }
 0x291   : > { %1488 = vrot.lane.b32.xlu1 %v3688_v7, %s4081_s5  ;;  %s1229_s5 = scalar_lea.vmem %s4139_s9, %s3676_s1  ;;  %s4161_s9 = sld [smem:[#allocation22_spill]] }
 0x292   : > { %v3765_v46 = vld [vmem:[%s1229_s5] sm:$0xff]  ;;  %s4085_s5 = smov 16  }
 0x2d5   : > { %v1312_v52 = vpop.xlane.xlu1 %1311 }
 0x2d6   : > { %3213 = vrcp.f32 %v1312_v52  ;;  %v1324_v59 = vand.u32 2147483648, %v1312_v52  ;;  %vm1318_vm3 = vweird.f32 %v1312_v52  ;;  %v1322_v62 = vand.u32 2147483647, %v1312_v52 }
 0x2d8   : > { %v1325_v0 = vor.u32 1.1754944e-38, %v1324_v59  ;;  %vm1323_vm5 = vcmp.eq.f32.partialorder %v1322_v62, 8.507059e+37 }
 0x2dc   : > { %v3214_v54 = vpop.eup %3213 }
 0x2dd   : > { %v1314_v55 = vmul.f32 %v3214_v54, %v1312_v52  ;;  %vm1319_vm2 = vweird.f32 %v3214_v54 }
 0x2de   : > { %v3739_v57 = vpop.xlane.xlu0 %1471  ;;  %vm1320_vm4 = vmor %vm1318_vm3, %vm1319_vm2 }
 0x2df   : > { %v1315_v56 = vsub.f32 1.0, %v1314_v55  ;;  %3215 = vrcp.f32 %v3739_v57  ;;  %v1484_v33 = vand.u32 2147483648, %v3739_v57  ;;  %vm1478_vm14 = vweird.f32 %v3739_v57  ;;  %v1612_v55 = vld [vmem:[%s3455_s29 + $0x8] sm:$0xff] }
 0x2e0   : > { %v1482_v35 = vand.u32 2147483647, %v3739_v57 }
 0x2e1   : > { %v1316_v58 = vmul.f32 %v3214_v54, %v1315_v56  ;;  %v1485_v41 = vor.u32 1.1754944e-38, %v1484_v33  ;;  %v1611_v56 = vld [vmem:[%s3455_s29] sm:$0xff] }
 0x2e2   : > { %vm1483_vm3 = vcmp.eq.f32.partialorder %v1482_v35, 8.507059e+37 }
 0x2e3   : > { %v1392_v60 = vpop.xlane.xlu2 %1391  ;;  %v1317_v61 = vadd.f32 %v3214_v54, %v1316_v58 }
 0x2e4   : > { %3217 = vrcp.f32 %v1392_v60  ;;  %v1404_v11 = vand.u32 2147483648, %v1392_v60  ;;  %v1402_v13 = vand.u32 2147483647, %v1392_v60  ;;  %vm1398_vm7 = vweird.f32 %v1392_v60 }
 0x2e5   : > { %v1321_v63 = vsel %vm1320_vm4, %v3214_v54, %v1317_v61  ;;  %v3742_v2 = vpop.eup %3215  ;;  %v1613_v54 = vld [vmem:[%s3455_s29 + $0x10] sm:$0xff]  ;;  %vm1607_vm4 = vcmask 130048  }
 0x2e6   : > { %v1326_v1 = vsel %vm1323_vm5, %v1325_v0, %v1321_v63  ;;  %v1474_v9 = vmul.f32 %v3742_v2, %v3739_v57  ;;  %v1405_v18 = vor.u32 1.1754944e-38, %v1404_v11  ;;  %vm1403_vm9 = vcmp.eq.f32.partialorder %v1402_v13, 8.507059e+37  ;;  %v3185_v0 = vld [vmem:[%s4141_s3] ss:$0 sm:$0xff]  ;;  %s4157_s3 = smov 16  }
 0x2e7   : > { %v1327_v8 = vmul.f32 %v3206_v37, %v1326_v1  ;;  %vm1479_vm11 = vweird.f32 %v3742_v2  ;;  %v1785_v37 = vld [vmem:[%s3505_s27] sm:$0xff]  ;;  %vm1609_vm5 = vcmask 195584  }
 0x2e8   : > { %v1475_v15 = vsub.f32 1.0, %v1474_v9  ;;  %vm1480_vm2 = vmor %vm1478_vm14, %vm1479_vm11  ;;  %vm1726_vm14 = vcmask 523264  }
 0x2ea   : > { %v3218_v3 = vpop.eup %3217  ;;  %v1476_v22 = vmul.f32 %v3742_v2, %v1475_v15 }
 0x2eb   : > { %v1394_v5 = vmul.f32 %v3218_v3, %v1392_v60  ;;  %v1552_v6 = vpop.xlane.xlu1 %1551  ;;  %v1329_v7 = vpop.permute.xlu2 %1328  ;;  %vm1399_vm6 = vweird.f32 %v3218_v3 }
 0x2ec   : > { %3219 = vrcp.f32 %v1552_v6  ;;  %1349 = vmatpush.msra.mxu2 %v1329_v7  ;;  %vm1400_vm8 = vmor %vm1398_vm7, %vm1399_vm6  ;;  %v1564_v26 = vand.u32 2147483648, %v1552_v6  ;;  %v1562_v28 = vand.u32 2147483647, %v1552_v6  ;;  %v1477_v30 = vadd.f32 %v3742_v2, %v1476_v22 }
 0x2ed   : > { %v1395_v10 = vsub.f32 1.0, %v1394_v5  ;;  %3027 = vmatmul.msk.f32.vlgmr.msra.gmra.mxu2 %vm1274_vm1, %v1327_v8  ;;  %vm1558_vm12 = vweird.f32 %v1552_v6 }
 0x2ee   : > { %1429 = vmatpush.msrb.mxu2 %v1409_v53  ;;  %v1565_v34 = vor.u32 1.1754944e-38, %v1564_v26  ;;  %vm1563_vm15 = vcmp.eq.f32.partialorder %v1562_v28, 8.507059e+37  ;;  %v1481_v40 = vsel %vm1480_vm2, %v3742_v2, %v1477_v30  ;;  %v1614_v53 = vld [vmem:[%s3455_s29 + $0x18] sm:$0xff]  ;;  %v1684_v30 = vld [vmem:[%s3475_s19 + $0x10] sm:$0xff] }
 0x2ef   : > { %v1396_v12 = vmul.f32 %v3218_v3, %v1395_v10  ;;  %v1486_v42 = vsel %vm1483_vm3, %v1485_v41, %v1481_v40  ;;  %1634 = vmatpush.msrb.mxu1 %v1614_v53  ;;  %v1721_v40 = vld [vmem:[%s3485_s30 + $0x38] sm:$0xff]  ;;  %v1720_v41 = vld [vmem:[%s3485_s30 + $0x30] sm:$0xff]  ;;  %v3186_v53 = vld [vmem:[%s4148_s8] ss:$0 sm:$0xff]  ;;  %s4160_s8 = sld [smem:[#allocation19_spill]] }
 0x2f0   : > { %v1487_v45 = vmul.f32 %v3721_v43, %v1486_v42  ;;  %v3184_v43 = vld [vmem:[%s4140_s4] ss:$0 sm:$0xff]  ;;  %1738 = vmatpush.msrb.mxu0 %v1721_v40  ;;  %s4159_s4 = sld [smem:[#allocation18_spill]] }
 0x2f1   : > { %v1569_v14 = vpop.permute.xlu0 %1568  ;;  %v1397_v16 = vadd.f32 %v3218_v3, %v1396_v12  ;;  %1635 = vmatpush.msrb.mxu1 %v1613_v54 }
 0x2f2   : > { %1589 = vmatpush.msra.mxu2 %v1569_v14  ;;  %v3220_v17 = vpop.eup %3219  ;;  %1739 = vmatpush.msrb.mxu0 %v1720_v41 }
 0x2f3   : > { %v1554_v19 = vmul.f32 %v3220_v17, %v1552_v6  ;;  %v1401_v20 = vsel %vm1400_vm8, %v3218_v3, %v1397_v16  ;;  %vm1559_vm10 = vweird.f32 %v3220_v17  ;;  %1636 = vmatpush.msrb.mxu1 %v1612_v55 }
 0x2f4   : > { %v1406_v21 = vsel %vm1403_vm9, %v1405_v18, %v1401_v20  ;;  %vm1560_vm13 = vmor %vm1558_vm12, %vm1559_vm10 }
 0x2f5   : > { %v1555_v23 = vsub.f32 1.0, %v1554_v19  ;;  %v1407_v24 = vmul.f32 %v3725_v47, %v1406_v21  ;;  %1637 = vmatpush.msrb.mxu1 %v1611_v56 }
 0x2f7   : > { %v1556_v27 = vmul.f32 %v3220_v17, %v1555_v23  ;;  %3030 = vmatmul.msk.f32.vlgmr.msrb.gmra.mxu2 %vm1274_vm1, %v1407_v24 }
 0x2f8   : > { %1808 = vmatpush.msrb.mxu2 %v1788_v25 }
 0x2f9   : > { %v1557_v31 = vadd.f32 %v3220_v17, %v1556_v27 }
 0x2fa   : > { %1809 = vmatpush.msrb.mxu2 %v1787_v29  ;;  %v1685_v29 = vld [vmem:[%s3475_s19 + $0x18] sm:$0xff] }
 0x2fb   : > { %v1561_v36 = vsel %vm1560_vm13, %v3220_v17, %v1557_v31  ;;  %v1683_v31 = vld [vmem:[%s3475_s19 + $0x8] sm:$0xff] }
 0x2fc   : > { %v1566_v38 = vsel %vm1563_vm15, %v1565_v34, %v1561_v36  ;;  %1810 = vmatpush.msrb.mxu2 %v1786_v32  ;;  %v1682_v32 = vld [vmem:[%s3475_s19] sm:$0xff] }
 0x2fd   : > { %v1567_v39 = vmul.f32 %v3729_v50, %v1566_v38 }
 0x2fe   : > { %1811 = vmatpush.msrb.mxu2 %v1785_v37 }
 0x2ff   : > { %3036 = vmatmul.msk.f32.vlgmr.msra.gmra.mxu2 %vm1274_vm1, %v1567_v39 }
 0x303   : > { %v1489_v44 = vpop.permute.xlu1 %1488 }
 0x304   : > { %1509 = vmatpush.msrb.mxu3 %v1489_v44  ;;  %v1719_v44 = vld [vmem:[%s3485_s30 + $0x28] sm:$0xff] }
 0x305   : > { %3033 = vmatmul.msk.f32.vlgmr.msrb.gmra.mxu3 %vm1274_vm1, %v1487_v45  ;;  %1740 = vmatpush.msrb.mxu0 %v1719_v44 }
 0x306   : > { %1705 = vmatpush.msra.mxu3 %v1685_v29 }
 0x307   : > { %3040 = vmatmul.msk.f32.vlgmr.msrb.gmra.mxu2 %vm1247_vm0, %v3765_v46 }
 0x308   : > { %1706 = vmatpush.msra.mxu3 %v1684_v30 }
 0x30a   : > { %1707 = vmatpush.msra.mxu3 %v1683_v31 }
 0x30c   : > { %1708 = vmatpush.msra.mxu3 %v1682_v32 }
 0x370   : > { %v1351_v47 = vpop.f32.mrf.mxu2 }
 0x37a   : > { %v1431_v48 = vpop.f32.mrf.mxu2 }
 0x37b   : > { %1595 = vrot.lane.b32.xlu2 %v1431_v48, %s4092_s11  ;;  %v1718_v48 = vld [vmem:[%s3485_s30 + $0x20] sm:$0xff] }
 0x37c   : > { %1741 = vmatpush.msrb.mxu0 %v1718_v48 }
 0x382   : > { %v1591_v49 = vpop.f32.mrf.mxu2 }
 0x383   : > { %1603 = vrot.lane.b32.xlu0 %v1591_v49, %s4090_s10  ;;  %s4153_s10 = smov 48  }
 0x388   : > { %v1511_v50 = vpop.f32.mrf.mxu3 }
 0x389   : > { %1599 = vrot.lane.b32.xlu1 %v1511_v50, %s4085_s5  ;;  %s4143_s5 = smov 80  }
 0x38a   : > { %v1813_v51 = vpop.f32.mrf.mxu2 }
 0x38b   : > { %v3774_v52 = vadd.f32 %v3184_v43, %v1813_v51  ;;  %v1717_v43 = vld [vmem:[%s3485_s30 + $0x18] sm:$0xff] }
 0x38c   : > { %1742 = vmatpush.msrb.mxu0 %v1717_v43 }
 0x38d   : > { %1817 = vrot.lane.b32.xlu2 %v3774_v52, %s4084_s18  ;;  %s1236_s18 = scalar_lea.vmem %s4142_s17, %s3676_s1  ;;  %s4144_s1 = smov 112  }
 0x38e   : > { %v3794_v7 = vld [vmem:[%s1236_s18] sm:$0xff]  ;;  %s4145_s18 = smov 64  }
 0x3d5   : > { %v1596_v57 = vpop.permute.xlu2 %1595 }
 0x3d6   : > { %v1606_v59 = vsel %vm1274_vm1, %v1351_v47, %v1596_v57 }
 0x3e7   : > { %v1818_v58 = vpop.permute.xlu2 %1817 }
 0x3e8   : > { %3041 = vmatpush.xpose.msk.msra.mxu1 %vm1274_vm1, %v1818_v58  ;;  %v3187_v58 = vld [vmem:[%s4149_s14] ss:$0 sm:$0xff]  ;;  %s4162_s14 = sld [smem:[#allocation28_spill]] }
 0x3f5   : > { %v1604_v61 = vpop.permute.xlu0 %1603 }
 0x3fb   : > { %v1600_v60 = vpop.permute.xlu1 %1599 }
 0x3fc   : > { %v1608_v62 = vsel %vm1607_vm4, %v1606_v59, %v1600_v60 }
 0x3fd   : > { %v1610_v63 = vsel %vm1609_vm5, %v1608_v62, %v1604_v61 }
 0x3fe   : > { %3037 = vmatmul.msk.f32.vlgmr.msrb.gmra.mxu1 %vm1247_vm0, %v1610_v63 }
 0x406   : > { %3042 = vmatmul.msk.f32.vlgmr.msra.gmra.mxu1 %vm1274_vm1, %v3774_v52 }
 0x47b   : > { %v1639_v1 = vpop.f32.mrf.mxu1 }
 0x47c   : > { %v1640_v2 = vadd.f32 %v3185_v0, %v1639_v1 }
 0x47e   : > { %v1642_v3 = vadd.f32 %v1640_v2, %v3683_v4  ;;  %v3415_v4 = vmov 32.0  }
 0x47f   : > { %3221 = vrcp.f32 %v3415_v4 }
 0x480   : > { %v1645_v5 = vsel %vm1247_vm0, %v1642_v3, 0.0 }
 0x481   : > { %1646 = vadd.xlane.f32.xlu1 %v1645_v5 }
 0x483   : > { %v1840_v6 = vpop.f32.mrf.mxu1 }
 0x484   : > { %v1843_v8 = vmul.f32 0.35355338, %v1840_v6 }
 0x485   : > { %v3222_v11 = vpop.eup %3221 }
 0x486   : > { %v1844_v9 = vadd.f32 %v1843_v8, %v3794_v7  ;;  %v1649_v12 = vmul.f32 32.0, %v3222_v11  ;;  %vm1653_vm6 = vweird.f32 %v3222_v11 }
 0x488   : > { %v1845_v10 = vsel %vm1274_vm1, %v1844_v9, -inf  ;;  %v1650_v13 = vsub.f32 1.0, %v1649_v12 }
 0x489   : > { %1846 = vmax.xlane.f32.xlu0 %v1845_v10 }
 0x48a   : > { %v1651_v14 = vmul.f32 %v3222_v11, %v1650_v13  ;;  %v1716_v13 = vld [vmem:[%s3485_s30 + $0x10] sm:$0xff] }
 0x48b   : > { %1743 = vmatpush.msrb.mxu0 %v1716_v13 }
 0x48c   : > { %v1652_v15 = vadd.f32 %v3222_v11, %v1651_v14  ;;  %v1715_v14 = vld [vmem:[%s3485_s30 + $0x8] sm:$0xff] }
 0x48d   : > { %1744 = vmatpush.msrb.mxu0 %v1715_v14 }
 0x48e   : > { %v3806_v16 = vsel %vm1653_vm6, %v3222_v11, %v1652_v15  ;;  %v1714_v15 = vld [vmem:[%s3485_s30] sm:$0xff] }
 0x48f   : > { %1745 = vmatpush.msrb.mxu0 %v1714_v15 }
 0x49a   : > { %1895 = vrot.lane.b32.xlu1 %v3774_v52, %s4088_s21  ;;  %s4147_s21 = smov 104  }
 0x49d   : > { %1897 = vrot.lane.b32.xlu0 %v3774_v52, %s4087_s13  ;;  %s4146_s13 = smov 72  }
 0x4a5   : > { %1977 = vrot.lane.b32.xlu0 %v3774_v52, %s4143_s5 }
 0x4ad   : > { %1975 = vrot.lane.b32.xlu0 %v3774_v52, %s4144_s1 }
 0x4f4   : > { %v1647_v17 = vpop.xlane.xlu1 %1646 }
 0x4f5   : > { %v1655_v18 = vmul.f32 %v3806_v16, %v1647_v17 }
 0x4f7   : > { %v1656_v19 = vsub.f32 %v1642_v3, %v1655_v18 }
 0x4f9   : > { %v1657_v20 = vmul.f32 %v1656_v19, %v1656_v19 }
 0x4fb   : > { %v1658_v21 = vsel %vm1247_vm0, %v1657_v20, 0.0 }
 0x4fc   : > { %1659 = vadd.xlane.f32.xlu2 %v1658_v21  ;;  %v1847_v22 = vpop.xlane.xlu0 %1846 }
 0x4fd   : > { %v1848_v23 = vsub.f32 %v1844_v9, %v1847_v22 }
 0x4ff   : > { %v1849_v24 = vmul.f32 1.442695, %v1848_v23 }
 0x501   : > { %3223 = vpow2.f32 %v1849_v24 }
 0x507   : > { %v3810_v25 = vpop.eup %3223 }
 0x508   : > { %v1851_v26 = vsel %vm1274_vm1, %v3810_v25, 0.0 }
 0x509   : > { %1852 = vadd.xlane.f32.xlu1 %v1851_v26 }
 0x50c   : > { %v1896_v28 = vpop.permute.xlu1 %1895 }
 0x50f   : > { %v1898_v27 = vpop.permute.xlu0 %1897 }
 0x510   : > { %3044 = vmatpush.xpose.msk.msra.mxu2 %vm1274_vm1, %v1898_v27 }
 0x513   : > { %3045 = vmatmul.msk.f32.vlgmr.msra.gmra.mxu2 %vm1274_vm1, %v1896_v28 }
 0x514   : > { %1869 = vrot.lane.b32.xlu2 %v3774_v52, %s4145_s18  ;;  %s4150_s18 = sld [smem:[#allocation16_spill]] }
 0x517   : > { %v1978_v1 = vpop.permute.xlu0 %1977 }
 0x51a   : > { %v3188_v17 = vld [vmem:[%s4150_s18] ss:$0 sm:$0xff]  ;;  %s4151_s18 = smov 56  }
 0x51c   : > { %2057 = vrot.lane.b32.xlu2 %v3774_v52, %s4146_s13 }
 0x51f   : > { %v1976_v11 = vpop.permute.xlu0 %1975 }
 0x522   : > { %2055 = vrot.lane.b32.xlu1 %v3774_v52, %s4147_s21 }
 0x56f   : > { %v1660_v33 = vpop.xlane.xlu2 %1659 }
 0x570   : > { %v1661_v34 = vmul.f32 %v1660_v33, %v3806_v16 }
 0x572   : > { %v1662_v35 = vadd.f32 1e-05, %v1661_v34 }
 0x574   : > { %3225 = vrsqrt.f32 %v1662_v35  ;;  %vm1669_vm8 = vweird.f32 %v1662_v35 }
 0x577   : > { %v1870_v36 = vpop.permute.xlu2 %1869 }
 0x578   : > { %1890 = vmatpush.msrb.mxu3 %v1870_v36 }
 0x57a   : > { %v3226_v37 = vpop.eup %3225 }
 0x57b   : > { %v1664_v38 = vmul.f32 %v3226_v37, %v1662_v35  ;;  %vm1670_vm7 = vweird.f32 %v3226_v37 }
 0x57c   : > { %v1853_v39 = vpop.xlane.xlu1 %1852  ;;  %vm1671_vm9 = vmor %vm1669_vm8, %vm1670_vm7 }
 0x57d   : > { %v1665_v42 = vmul.f32 %v3226_v37, %v1664_v38  ;;  %3227 = vrcp.f32 %v1853_v39  ;;  %v1865_v61 = vand.u32 2147483648, %v1853_v39  ;;  %vm1859_vm11 = vweird.f32 %v1853_v39 }
 0x57e   : > { %v1863_v63 = vand.u32 2147483647, %v1853_v39 }
 0x57f   : > { %v1666_v45 = vmul.f32 0.5, %v1665_v42  ;;  %v2058_v47 = vpop.permute.xlu2 %2057  ;;  %v1866_v3 = vor.u32 1.1754944e-38, %v1865_v61 }
 0x580   : > { %3050 = vmatpush.xpose.msk.msrb.mxu2 %vm1274_vm1, %v2058_v47  ;;  %vm1864_vm13 = vcmp.eq.f32.partialorder %v1863_v63, 8.507059e+37 }
 0x581   : > { %v1667_v49 = vsub.f32 1.5, %v1666_v45 }
 0x583   : > { %v3228_v50 = vpop.eup %3227  ;;  %v1668_v51 = vmul.f32 %v3226_v37, %v1667_v49 }
 0x584   : > { %v1855_v54 = vmul.f32 %v3228_v50, %v1853_v39  ;;  %vm1860_vm10 = vweird.f32 %v3228_v50 }
 0x585   : > { %v1672_v55 = vsel %vm1671_vm9, %v3226_v37, %v1668_v51  ;;  %vm1861_vm12 = vmor %vm1859_vm11, %vm1860_vm10 }
 0x586   : > { %v1673_v56 = vmul.f32 %v1672_v55, %v1656_v19  ;;  %v1856_v57 = vsub.f32 1.0, %v1855_v54 }
 0x588   : > { %v1677_v59 = vmul.f32 %v3186_v53, %v1673_v56  ;;  %v1857_v60 = vmul.f32 %v3228_v50, %v1856_v57 }
 0x58a   : > { %v1858_v62 = vadd.f32 %v3228_v50, %v1857_v60  ;;  %v3835_v0 = vadd.f32 %v3187_v58, %v1677_v59 }
 0x58c   : > { %v1862_v2 = vsel %vm1861_vm12, %v3228_v50, %v1858_v62  ;;  %3038 = vmatmul.msk.f32.vlgmr.msra.gmra.mxu3 %vm1247_vm0, %v3835_v0 }
 0x58d   : > { %3047 = vmatpush.xpose.msk.msra.mxu3 %vm1274_vm1, %v1978_v1  ;;  %v1867_v5 = vsel %vm1864_vm13, %v1866_v3, %v1862_v2 }
 0x58e   : > { %v1868_v6 = vmul.f32 %v3810_v25, %v1867_v5 }
 0x594   : > { %v2056_v8 = vpop.permute.xlu1 %2055  ;;  %3043 = vmatmul.msk.f32.vlgmr.msrb.gmra.mxu3 %vm1274_vm1, %v1868_v6 }
 0x595   : > { %3051 = vmatmul.msk.f32.vlgmr.msrb.gmra.mxu2 %vm1274_vm1, %v2056_v8 }
 0x596   : > { %v1920_v9 = vpop.f32.mrf.mxu2 }
 0x597   : > { %v1923_v10 = vmul.f32 0.35355338, %v1920_v9 }
 0x599   : > { %v1924_v4 = vadd.f32 %v1923_v10, %v3794_v7 }
 0x59b   : > { %v1925_v12 = vsel %vm1274_vm1, %v1924_v4, -inf }
 0x59c   : > { %1926 = vmax.xlane.f32.xlu2 %v1925_v12  ;;  %3048 = vmatmul.msk.f32.vlgmr.msra.gmra.mxu3 %vm1274_vm1, %v1976_v11 }
 0x60f   : > { %v1710_v18 = vpop.f32.mrf.mxu3  ;;  %v1927_v19 = vpop.xlane.xlu2 %1926 }
 0x610   : > { %v1711_v20 = vadd.f32 %v3188_v17, %v1710_v18  ;;  %v1928_v21 = vsub.f32 %v1924_v4, %v1927_v19 }
 0x612   : > { %v1713_v22 = vmax.f32 %v1711_v20, 0.0  ;;  %v1929_v23 = vmul.f32 1.442695, %v1928_v21 }
 0x614   : > { %3229 = vpow2.f32 %v1929_v23  ;;  %3039 = vmatmul.msk.f32.vlgmr.msrb.gmra.mxu0 %vm1726_vm14, %v1713_v22 }
 0x617   : > { %v3851_v24 = vpop.f32.mrf.mxu3 }
 0x618   : > { %v2080_v25 = vpop.f32.mrf.mxu2 }
 0x619   : > { %v2083_v26 = vmul.f32 0.35355338, %v2080_v25 }
 0x61a   : > { %v3230_v27 = vpop.eup %3229 }
 0x61b   : > { %v1931_v28 = vsel %vm1274_vm1, %v3230_v27, 0.0  ;;  %v2084_v29 = vadd.f32 %v2083_v26, %v3794_v7 }
 0x61c   : > { %1932 = vadd.xlane.f32.xlu2 %v1931_v28 }
 0x61d   : > { %v2085_v30 = vsel %vm1274_vm1, %v2084_v29, -inf }
 0x61e   : > { %2086 = vmax.xlane.f32.xlu1 %v2085_v30 }
 0x61f   : > { %v2000_v31 = vpop.f32.mrf.mxu3 }
 0x620   : > { %v2003_v32 = vmul.f32 0.35355338, %v2000_v31 }
 0x622   : > { %v2004_v33 = vadd.f32 %v2003_v32, %v3794_v7 }
 0x624   : > { %v2005_v34 = vsel %vm1274_vm1, %v2004_v33, -inf }
 0x625   : > { %2006 = vmax.xlane.f32.xlu0 %v2005_v34 }
 0x634   : > { %1949 = vrot.lane.b32.xlu2 %v3774_v52, %s4151_s18  ;;  %s4152_s18 = smov 40  }
 0x68f   : > { %v1933_v35 = vpop.xlane.xlu2 %1932 }
 0x690   : > { %3231 = vrcp.f32 %v1933_v35  ;;  %v1945_v7 = vand.u32 2147483648, %v1933_v35  ;;  %v1943_v48 = vand.u32 2147483647, %v1933_v35  ;;  %vm1939_vm2 = vweird.f32 %v1933_v35 }
 0x691   : > { %v2087_v36 = vpop.xlane.xlu1 %2086  ;;  %v1747_v26 = vpop.f32.mrf.mxu0 }
 0x692   : > { %v2088_v37 = vsub.f32 %v2084_v29, %v2087_v36  ;;  %v1946_v53 = vor.u32 1.1754944e-38, %v1945_v7  ;;  %vm1944_vm6 = vcmp.eq.f32.partialorder %v1943_v48, 8.507059e+37 }
 0x694   : > { %v2089_v38 = vmul.f32 1.442695, %v2088_v37 }
 0x696   : > { %v3232_v39 = vpop.eup %3231  ;;  %3233 = vpow2.f32 %v2089_v38 }
 0x697   : > { %v1935_v40 = vmul.f32 %v3232_v39, %v1933_v35  ;;  %v1950_v41 = vpop.permute.xlu2 %1949  ;;  %vm1940_vm15 = vweird.f32 %v3232_v39 }
 0x698   : > { %v2007_v42 = vpop.xlane.xlu0 %2006  ;;  %1970 = vmatpush.msrb.mxu1 %v1950_v41  ;;  %vm1941_vm3 = vmor %vm1939_vm2, %vm1940_vm15 }
 0x699   : > { %v1936_v44 = vsub.f32 1.0, %v1935_v40  ;;  %v2008_v45 = vsub.f32 %v2004_v33, %v2007_v42 }
 0x69b   : > { %v1937_v47 = vmul.f32 %v3232_v39, %v1936_v44  ;;  %v2009_v49 = vmul.f32 1.442695, %v2008_v45 }
 0x69c   : > { %v3234_v43 = vpop.eup %3233 }
 0x69d   : > { %v1938_v50 = vadd.f32 %v3232_v39, %v1937_v47  ;;  %3235 = vpow2.f32 %v2009_v49  ;;  %v2091_v51 = vsel %vm1274_vm1, %v3234_v43, 0.0 }
 0x69e   : > { %2092 = vadd.xlane.f32.xlu1 %v2091_v51 }
 0x69f   : > { %v1942_v54 = vsel %vm1941_vm3, %v3232_v39, %v1938_v50 }
 0x6a0   : > { %v1947_v55 = vsel %vm1944_vm6, %v1946_v53, %v1942_v54 }
 0x6a1   : > { %v1948_v56 = vmul.f32 %v3230_v27, %v1947_v55 }
 0x6a3   : > { %v3236_v57 = vpop.eup %3235  ;;  %3046 = vmatmul.msk.f32.vlgmr.msrb.gmra.mxu1 %vm1274_vm1, %v1948_v56 }
 0x6a4   : > { %v2011_v58 = vsel %vm1274_vm1, %v3236_v57, 0.0 }
 0x6a5   : > { %2012 = vadd.xlane.f32.xlu0 %v2011_v58 }
 0x6b7   : > { %2109 = vrot.lane.b32.xlu1 %v3774_v52, %s4152_s18  ;;  %s4155_s18 = sld [smem:[#allocation21_spill]] }
 0x6b9   : > { %2029 = vrot.lane.b32.xlu0 %v3774_v52, %s4153_s10  ;;  %s4154_s10 = sld [smem:[#allocation17_spill]] }
 0x6bd   : > { %v2152_v38 = vld [vmem:[%s4155_s18 + $0x10] sm:$0xff]  ;;  %v2151_v39 = vld [vmem:[%s4155_s18 + $0x8] sm:$0xff]  ;;  %v2150_v40 = vld [vmem:[%s4155_s18] sm:$0xff] }
 0x6bf   : > { %v3189_v25 = vld [vmem:[%s4154_s10] ss:$0 sm:$0xff]  ;;  %s4158_s10 = sld [smem:[#allocation27_spill]] }
 0x6c0   : > { %v1748_v27 = vadd.f32 %v3189_v25, %v1747_v26 }
 0x6c2   : > { %v1750_v28 = vadd.f32 %v1748_v27, %v3835_v0  ;;  %v2153_v0 = vld [vmem:[%s4155_s18 + $0x18] sm:$0xff] }
 0x6c3   : > { %2173 = vmatpush.msrb.mxu3 %v2153_v0 }
 0x6c4   : > { %v1753_v29 = vsel %vm1247_vm0, %v1750_v28, 0.0 }
 0x6c5   : > { %2174 = vmatpush.msrb.mxu3 %v2152_v38  ;;  %v2248_v47 = vld [vmem:[%s4158_s10 + $0x18] sm:$0xff]  ;;  %v2247_v48 = vld [vmem:[%s4158_s10 + $0x10] sm:$0xff]  ;;  %v2246_v49 = vld [vmem:[%s4158_s10 + $0x8] sm:$0xff] }
 0x6c6   : > { %2268 = vmatpush.msra.mxu2 %v2248_v47 }
 0x6c7   : > { %2175 = vmatpush.msrb.mxu3 %v2151_v39 }
 0x6c8   : > { %2269 = vmatpush.msra.mxu2 %v2247_v48 }
 0x6c9   : > { %2176 = vmatpush.msrb.mxu3 %v2150_v40 }
 0x6ca   : > { %2270 = vmatpush.msra.mxu2 %v2246_v49 }
 0x711   : > { %v2093_v59 = vpop.xlane.xlu1 %2092 }
 0x712   : > { %3237 = vrcp.f32 %v2093_v59  ;;  %v2105_v5 = vand.u32 2147483648, %v2093_v59  ;;  %vm2099_vm8 = vweird.f32 %v2093_v59  ;;  %v2103_v9 = vand.u32 2147483647, %v2093_v59 }
 0x714   : > { %v2106_v11 = vor.u32 1.1754944e-38, %v2105_v5  ;;  %vm2104_vm11 = vcmp.eq.f32.partialorder %v2103_v9, 8.507059e+37  ;;  %v3193_v9 = vld [vmem:[%s4162_s14] ss:$0 sm:$0xff]  ;;  %s4166_s14 = sld [smem:[#allocation24_spill]] }
 0x718   : > { %v3238_v60 = vpop.eup %3237  ;;  %v2013_v61 = vpop.xlane.xlu0 %2012 }
 0x719   : > { %v2095_v62 = vmul.f32 %v3238_v60, %v2093_v59  ;;  %3239 = vrcp.f32 %v2013_v61  ;;  %vm2100_vm7 = vweird.f32 %v3238_v60  ;;  %v2025_v4 = vand.u32 2147483648, %v2013_v61  ;;  %v3190_v59 = vld [vmem:[%s4159_s4] ss:$0 sm:$0xff]  ;;  %s4167_s4 = sld [smem:[#allocation26_spill]] }
 0x71a   : > { %vm2101_vm9 = vmor %vm2099_vm8, %vm2100_vm7  ;;  %v2023_v13 = vand.u32 2147483647, %v2013_v61  ;;  %vm2019_vm12 = vweird.f32 %v2013_v61 }
 0x71b   : > { %v2096_v63 = vsub.f32 1.0, %v2095_v62  ;;  %v2026_v17 = vor.u32 1.1754944e-38, %v2025_v4  ;;  %v3191_v62 = vld [vmem:[%s4160_s8] ss:$0 sm:$0xff]  ;;  %s4164_s8 = smov 120  }
 0x71c   : > { %vm2024_vm15 = vcmp.eq.f32.partialorder %v2023_v13, 8.507059e+37 }
 0x71d   : > { %v2097_v1 = vmul.f32 %v3238_v60, %v2096_v63 }
 0x71f   : > { %v3240_v2 = vpop.eup %3239  ;;  %v2098_v3 = vadd.f32 %v3238_v60, %v2097_v1  ;;  %v3196_v0 = vld [vmem:[%s4167_s4] ss:$0 sm:$0xff]  ;;  %s4173_s4 = sld [smem:[#allocation33_spill]] }
 0x720   : > { %v2015_v6 = vmul.f32 %v3240_v2, %v2013_v61  ;;  %v1972_v8 = vpop.f32.mrf.mxu1  ;;  %vm2020_vm10 = vweird.f32 %v3240_v2 }
 0x721   : > { %2136 = vrot.lane.b32.xlu0 %v1972_v8, %s4092_s11  ;;  %v2102_v10 = vsel %vm2101_vm9, %v3238_v60, %v2098_v3  ;;  %vm2021_vm13 = vmor %vm2019_vm12, %vm2020_vm10  ;;  %s4156_s11 = smov 24  }
 0x722   : > { %v2016_v52 = vsub.f32 1.0, %v2015_v6  ;;  %v2107_v14 = vsel %vm2104_vm11, %v2106_v11, %v2102_v10 }
 0x723   : > { %v2108_v21 = vmul.f32 %v3234_v43, %v2107_v14  ;;  %v2245_v43 = vld [vmem:[%s4158_s10] sm:$0xff]  ;;  %s4163_s10 = sld [smem:[#allocation25_spill]] }
 0x724   : > { %v2017_v12 = vmul.f32 %v3240_v2, %v2016_v52  ;;  %2271 = vmatpush.msra.mxu2 %v2245_v43 }
 0x726   : > { %v2018_v15 = vadd.f32 %v3240_v2, %v2017_v12 }
 0x728   : > { %v2022_v18 = vsel %vm2021_vm13, %v3240_v2, %v2018_v15  ;;  %v3192_v2 = vld [vmem:[%s4161_s9] ss:$0 sm:$0xff]  ;;  %s4165_s9 = sld [smem:[#allocation23_spill]] }
 0x729   : > { %v2027_v19 = vsel %vm2024_vm15, %v2026_v17, %v2022_v18  ;;  %v2110_v20 = vpop.permute.xlu1 %2109  ;;  %v2217_v4 = vld [vmem:[%s4163_s10 + $0x18] sm:$0xff]  ;;  %v2216_v11 = vld [vmem:[%s4163_s10 + $0x10] sm:$0xff]  ;;  %v2214_v13 = vld [vmem:[%s4163_s10] sm:$0xff] }
 0x72a   : > { %2130 = vmatpush.msra.mxu1 %v2110_v20  ;;  %v2028_v22 = vmul.f32 %v3236_v57, %v2027_v19 }
 0x72b   : > { %v2030_v23 = vpop.permute.xlu0 %2029  ;;  %3052 = vmatmul.msk.f32.vlgmr.msra.gmra.mxu1 %vm1274_vm1, %v2108_v21 }
 0x72c   : > { %2050 = vmatpush.msra.mxu0 %v2030_v23 }
 0x72d   : > { %3049 = vmatmul.msk.f32.vlgmr.msra.gmra.mxu0 %vm1274_vm1, %v2028_v22 }
 0x72e   : > { %2237 = vmatpush.msrb.mxu0 %v2217_v4 }
 0x730   : > { %2238 = vmatpush.msrb.mxu0 %v2216_v11 }
 0x74b   : > { %1754 = vadd.xlane.f32.xlu0 %v1753_v29 }
 0x793   : > { %v2137_v32 = vpop.permute.xlu0 %2136 }
 0x794   : > { %v2147_v42 = vsel %vm1274_vm1, %v3851_v24, %v2137_v32 }
 0x7a8   : > { %v2132_v30 = vpop.f32.mrf.mxu1 }
 0x7a9   : > { %2144 = vrot.lane.b32.xlu1 %v2132_v30, %s4156_s11 }
 0x7aa   : > { %v2052_v31 = vpop.f32.mrf.mxu0 }
 0x7ab   : > { %2140 = vrot.lane.b32.xlu2 %v2052_v31, %s4157_s3  ;;  %v3194_v31 = vld [vmem:[%s4165_s9] ss:$0 sm:$0xff]  ;;  %s4169_s9 = smov 88  }
 0x7be   : > { %v1755_v33 = vpop.xlane.xlu0 %1754 }
 0x7bf   : > { %v1756_v34 = vmul.f32 %v1755_v33, %v3806_v16 }
 0x7c1   : > { %v1757_v35 = vsub.f32 %v1750_v28, %v1756_v34  ;;  %v3195_v34 = vld [vmem:[%s4166_s14] ss:$0 sm:$0xff]  ;;  %s4172_s14 = sld [smem:[#allocation30_spill]] }
 0x7c3   : > { %v1758_v36 = vmul.f32 %v1757_v35, %v1757_v35 }
 0x7c5   : > { %v1759_v37 = vsel %vm1247_vm0, %v1758_v36, 0.0 }
 0x7d3   : > { %1760 = vadd.xlane.f32.xlu1 %v1759_v37 }
 0x805   : > { %v2141_v41 = vpop.permute.xlu2 %2140 }
 0x806   : > { %v2148_v44 = vsel %vm1607_vm4, %v2147_v42, %v2141_v41 }
 0x81b   : > { %v2145_v45 = vpop.permute.xlu1 %2144 }
 0x81c   : > { %v2149_v7 = vsel %vm1609_vm5, %v2148_v44, %v2145_v45 }
 0x81d   : > { %3053 = vmatmul.msk.f32.vlgmr.msrb.gmra.mxu3 %vm1247_vm0, %v2149_v7  ;;  %v3265_v7 = vld [vmem:[%s3679_s7] ss:$0 sm:$0xff]  ;;  %s3953_s7 = sand.u32 1, %s3352_s23  }
 0x846   : > { %v1761_v50 = vpop.xlane.xlu1 %1760 }
 0x847   : > { %v1762_v24 = vmul.f32 %v1761_v50, %v3806_v16 }
 0x849   : > { %v1763_v51 = vadd.f32 1e-05, %v1762_v24 }
 0x84b   : > { %3241 = vrsqrt.f32 %v1763_v51  ;;  %vm1770_vm3 = vweird.f32 %v1763_v51 }
 0x851   : > { %v3242_v53 = vpop.eup %3241 }
 0x852   : > { %v1765_v54 = vmul.f32 %v3242_v53, %v1763_v51  ;;  %vm1771_vm2 = vweird.f32 %v3242_v53 }
 0x853   : > { %vm1772_vm6 = vmor %vm1770_vm3, %vm1771_vm2 }
 0x854   : > { %v1766_v55 = vmul.f32 %v3242_v53, %v1765_v54 }
 0x856   : > { %v1767_v56 = vmul.f32 0.5, %v1766_v55 }
 0x858   : > { %v1768_v57 = vsub.f32 1.5, %v1767_v56 }
 0x85a   : > { %v1769_v58 = vmul.f32 %v3242_v53, %v1768_v57 }
 0x85c   : > { %v1773_v60 = vsel %vm1772_vm6, %v3242_v53, %v1769_v58 }
 0x85d   : > { %v1774_v61 = vmul.f32 %v1773_v60, %v1757_v35 }
 0x85f   : > { %v1778_v63 = vmul.f32 %v3190_v59, %v1774_v61 }
 0x861   : > { %v1782_v1 = vadd.f32 %v3191_v62, %v1778_v63 }
 0x863   : > { %3055 = vmatmul.msk.f32.vlgmr.msra.gmra.mxu2 %vm1247_vm0, %v1782_v1 }
 0x8a0   : > { %v2178_v3 = vpop.f32.mrf.mxu3 }
 0x8a1   : > { %v2179_v5 = vadd.f32 %v3192_v2, %v2178_v3 }
 0x8a3   : > { %v2181_v6 = vadd.f32 %v2179_v5, %v3765_v46  ;;  %v2215_v46 = vld [vmem:[%s4163_s10 + $0x8] sm:$0xff] }
 0x8a4   : > { %2239 = vmatpush.msrb.mxu0 %v2215_v46 }
 0x8a5   : > { %v2184_v8 = vsel %vm1247_vm0, %v2181_v6, 0.0 }
 0x8a6   : > { %2185 = vadd.xlane.f32.xlu2 %v2184_v8  ;;  %2240 = vmatpush.msrb.mxu0 %v2214_v13 }
 0x8e6   : > { %v2273_v52 = vpop.f32.mrf.mxu2 }
 0x8e7   : > { %v3898_v10 = vadd.f32 %v3193_v9, %v2273_v52 }
 0x8e9   : > { %3056 = vmatpush.xpose.msk.msrb.mxu1 %vm1274_vm1, %v3898_v10  ;;  %2357 = vrot.lane.b32.xlu2 %v3898_v10, %s4164_s8 }
 0x8f1   : > { %2521 = vrot.lane.b32.xlu2 %v3898_v10, %s4147_s21 }
 0x919   : > { %v2186_v12 = vpop.xlane.xlu2 %2185 }
 0x91a   : > { %v2187_v14 = vmul.f32 %v2186_v12, %v3806_v16 }
 0x91c   : > { %v2188_v15 = vsub.f32 %v2181_v6, %v2187_v14 }
 0x91e   : > { %v2189_v17 = vmul.f32 %v2188_v15, %v2188_v15 }
 0x920   : > { %v2190_v18 = vsel %vm1247_vm0, %v2189_v17, 0.0 }
 0x921   : > { %2191 = vadd.xlane.f32.xlu0 %v2190_v18 }
 0x935   : > { %2439 = vrot.lane.b32.xlu0 %v3898_v10, %s4144_s1 }
 0x943   : > { %v2358_v19 = vpop.permute.xlu2 %2357 }
 0x944   : > { %3059 = vmatpush.xpose.msk.msra.mxu0 %vm1274_vm1, %v2358_v19 }
 0x94b   : > { %v2522_v37 = vpop.permute.xlu2 %2521 }
 0x994   : > { %v2192_v20 = vpop.xlane.xlu0 %2191 }
 0x995   : > { %v2193_v21 = vmul.f32 %v2192_v20, %v3806_v16 }
 0x997   : > { %v2194_v22 = vadd.f32 1e-05, %v2193_v21 }
 0x999   : > { %3243 = vrsqrt.f32 %v2194_v22  ;;  %vm2201_vm8 = vweird.f32 %v2194_v22 }
 0x99f   : > { %v3244_v23 = vpop.eup %3243 }
 0x9a0   : > { %v2196_v25 = vmul.f32 %v3244_v23, %v2194_v22  ;;  %vm2202_vm7 = vweird.f32 %v3244_v23 }
 0x9a1   : > { %vm2203_vm9 = vmor %vm2201_vm8, %vm2202_vm7 }
 0x9a2   : > { %v2197_v26 = vmul.f32 %v3244_v23, %v2196_v25 }
 0x9a4   : > { %v2198_v27 = vmul.f32 0.5, %v2197_v26 }
 0x9a6   : > { %v2199_v28 = vsub.f32 1.5, %v2198_v27 }
 0x9a7   : > { %v2440_v29 = vpop.permute.xlu0 %2439 }
 0x9a8   : > { %v2200_v30 = vmul.f32 %v3244_v23, %v2199_v28  ;;  %3063 = vmatpush.xpose.msk.msra.mxu1 %vm1274_vm1, %v2440_v29 }
 0x9aa   : > { %v2204_v32 = vsel %vm2203_vm9, %v3244_v23, %v2200_v30 }
 0x9ab   : > { %v2205_v33 = vmul.f32 %v2204_v32, %v2188_v15 }
 0x9ad   : > { %v2209_v35 = vmul.f32 %v3194_v31, %v2205_v33 }
 0x9af   : > { %v3919_v36 = vadd.f32 %v3195_v34, %v2209_v35 }
 0x9b1   : > { %3054 = vmatmul.msk.f32.vlgmr.msrb.gmra.mxu0 %vm1247_vm0, %v3919_v36 }
 0x9b2   : > { %3067 = vmatpush.xpose.msk.msrb.mxu0 %vm1274_vm1, %v2522_v37 }
 0xa2e   : > { %v2242_v38 = vpop.f32.mrf.mxu0 }
 0xa2f   : > { %v2243_v39 = vadd.f32 %v3196_v0, %v2242_v38 }
 0xa31   : > { %2437 = vrot.lane.b32.xlu0 %v2243_v39, %s4144_s1  ;;  %2355 = vrot.lane.b32.xlu1 %v2243_v39, %s4164_s8  ;;  %s3020_s1 = sshll.u32 %s3953_s7, 5 }
 0xa32   : > { %3057 = vmatmul.msk.f32.vlgmr.msrb.gmra.mxu1 %vm1274_vm1, %v2243_v39  ;;  %s3957_s8 = scalar_lea.vmem [#allocation4], %s3020_s1  ;;  %s4177_s1 = sld [smem:[#allocation34_spill]] }
 0xa39   : > { %2519 = vrot.lane.b32.xlu1 %v2243_v39, %s4147_s21  ;;  %s4168_s21 = smov 96  }
 0xaa3   : > { %v2356_v40 = vpop.permute.xlu1 %2355  ;;  %v2438_v41 = vpop.permute.xlu0 %2437 }
 0xaa4   : > { %3060 = vmatmul.msk.f32.vlgmr.msra.gmra.mxu0 %vm1274_vm1, %v2356_v40  ;;  %3064 = vmatmul.msk.f32.vlgmr.msra.gmra.mxu1 %vm1274_vm1, %v2438_v41 }
 0xaab   : > { %v2520_v42 = vpop.permute.xlu1 %2519 }
 0xaac   : > { %3068 = vmatmul.msk.f32.vlgmr.msrb.gmra.mxu0 %vm1274_vm1, %v2520_v42 }
 0xaaf   : > { %v2299_v44 = vpop.f32.mrf.mxu1 }
 0xab0   : > { %v2302_v45 = vmul.f32 0.35355338, %v2299_v44 }
 0xab2   : > { %v2303_v47 = vadd.f32 %v3265_v7, %v2302_v45 }
 0xab4   : > { %v2304_v48 = vsel %vm1274_vm1, %v2303_v47, -inf }
 0xab5   : > { %2305 = vmax.xlane.f32.xlu2 %v2304_v48 }
 0xb21   : > { %v2380_v49 = vpop.f32.mrf.mxu0  ;;  %v2462_v43 = vpop.f32.mrf.mxu1 }
 0xb22   : > { %v2383_v50 = vmul.f32 0.35355338, %v2380_v49  ;;  %v2465_v24 = vmul.f32 0.35355338, %v2462_v43 }
 0xb24   : > { %v2466_v51 = vadd.f32 %v3265_v7, %v2465_v24  ;;  %v2384_v53 = vadd.f32 %v3265_v7, %v2383_v50 }
 0xb26   : > { %v2467_v54 = vsel %vm1274_vm1, %v2466_v51, -inf  ;;  %v2385_v55 = vsel %vm1274_vm1, %v2384_v53, -inf }
 0xb27   : > { %2468 = vmax.xlane.f32.xlu1 %v2467_v54  ;;  %2386 = vmax.xlane.f32.xlu0 %v2385_v55 }
 0xb28   : > { %v2306_v56 = vpop.xlane.xlu2 %2305 }
 0xb29   : > { %v2307_v57 = vsub.f32 %v2303_v47, %v2306_v56  ;;  %v2544_v58 = vpop.f32.mrf.mxu0 }
 0xb2a   : > { %v2547_v59 = vmul.f32 0.35355338, %v2544_v58 }
 0xb2b   : > { %v2308_v60 = vmul.f32 1.442695, %v2307_v57 }
 0xb2c   : > { %v2548_v61 = vadd.f32 %v3265_v7, %v2547_v59 }
 0xb2d   : > { %3245 = vpow2.f32 %v2308_v60 }
 0xb2e   : > { %v2549_v62 = vsel %vm1274_vm1, %v2548_v61, -inf }
 0xb2f   : > { %2550 = vmax.xlane.f32.xlu2 %v2549_v62 }
 0xb33   : > { %v3246_v63 = vpop.eup %3245 }
 0xb34   : > { %v2310_v1 = vsel %vm1274_vm1, %v3246_v63, 0.0 }
 0xb35   : > { %2311 = vadd.xlane.f32.xlu0 %v2310_v1 }
 0xb47   : > { %2329 = vrot.lane.b32.xlu2 %v3898_v10, %s4168_s21  ;;  %s4176_s21 = sld [smem:[#allocation32_spill]] }
 0xb9a   : > { %v2469_v2 = vpop.xlane.xlu1 %2468  ;;  %v2387_v3 = vpop.xlane.xlu0 %2386 }
 0xb9b   : > { %v2470_v5 = vsub.f32 %v2466_v51, %v2469_v2  ;;  %v2388_v6 = vsub.f32 %v2384_v53, %v2387_v3 }
 0xb9d   : > { %v2471_v8 = vmul.f32 1.442695, %v2470_v5  ;;  %v2389_v9 = vmul.f32 1.442695, %v2388_v6 }
 0xb9f   : > { %3247 = vpow2.f32 %v2471_v8 }
 0xba0   : > { %3249 = vpow2.f32 %v2389_v9 }
 0xba2   : > { %v2551_v52 = vpop.xlane.xlu2 %2550 }
 0xba3   : > { %v2552_v4 = vsub.f32 %v2548_v61, %v2551_v52 }
 0xba5   : > { %v3940_v11 = vpop.eup %3247  ;;  %v2553_v46 = vmul.f32 1.442695, %v2552_v4 }
 0xba6   : > { %v3942_v12 = vpop.eup %3249  ;;  %v2473_v13 = vsel %vm1274_vm1, %v3940_v11, 0.0 }
 0xba7   : > { %3251 = vpow2.f32 %v2553_v46  ;;  %2474 = vadd.xlane.f32.xlu1 %v2473_v13  ;;  %v2391_v14 = vsel %vm1274_vm1, %v3942_v12, 0.0 }
 0xba8   : > { %2392 = vadd.xlane.f32.xlu2 %v2391_v14  ;;  %v2312_v15 = vpop.xlane.xlu0 %2311 }
 0xba9   : > { %3253 = vrcp.f32 %v2312_v15  ;;  %v2324_v23 = vand.u32 2147483648, %v2312_v15  ;;  %v2322_v26 = vand.u32 2147483647, %v2312_v15  ;;  %vm2318_vm11 = vweird.f32 %v2312_v15 }
 0xbaa   : > { %v2330_v17 = vpop.permute.xlu2 %2329 }
 0xbab   : > { %2350 = vmatpush.msra.mxu3 %v2330_v17  ;;  %v2325_v28 = vor.u32 1.1754944e-38, %v2324_v23  ;;  %vm2323_vm13 = vcmp.eq.f32.partialorder %v2322_v26, 8.507059e+37 }
 0xbad   : > { %v3948_v18 = vpop.eup %3251 }
 0xbae   : > { %v2555_v19 = vsel %vm1274_vm1, %v3948_v18, 0.0 }
 0xbaf   : > { %v3254_v20 = vpop.eup %3253  ;;  %2556 = vadd.xlane.f32.xlu0 %v2555_v19 }
 0xbb0   : > { %v2314_v21 = vmul.f32 %v3254_v20, %v2312_v15  ;;  %vm2319_vm10 = vweird.f32 %v3254_v20 }
 0xbb1   : > { %vm2320_vm12 = vmor %vm2318_vm11, %vm2319_vm10 }
 0xbb2   : > { %v2315_v22 = vsub.f32 1.0, %v2314_v21 }
 0xbb4   : > { %v2316_v25 = vmul.f32 %v3254_v20, %v2315_v22  ;;  %v3197_v22 = vld [vmem:[%s4172_s14] ss:$0 sm:$0xff]  ;;  %s4179_s14 = sld [smem:[#allocation37_spill]] }
 0xbb6   : > { %v2317_v27 = vadd.f32 %v3254_v20, %v2316_v25 }
 0xbb8   : > { %v2321_v29 = vsel %vm2320_vm12, %v3254_v20, %v2317_v27 }
 0xbb9   : > { %v2326_v30 = vsel %vm2323_vm13, %v2325_v28, %v2321_v29 }
 0xbba   : > { %v2327_v31 = vmul.f32 %v3246_v63, %v2326_v30 }
 0xbbc   : > { %3058 = vmatmul.msk.f32.vlgmr.msra.gmra.mxu3 %vm1274_vm1, %v2327_v31  ;;  %2328 = vst.msk [vmem:[%s3957_s8] sm:$0xff] %vm1274_vm1, %v2327_v31 }
 0xbc0   : > { %2575 = vrot.lane.b32.xlu2 %v3898_v10, %s4146_s13  ;;  %2411 = vrot.lane.b32.xlu1 %v3898_v10, %s4169_s9  ;;  %s4170_s13 = sld [smem:[#allocation29_spill]] }
 0xbc1   : > { %s4178_s9 = sld [smem:[#allocation36_spill]] }
 0xbc3   : > { %2493 = vrot.lane.b32.xlu0 %v3898_v10, %s4143_s5  ;;  %s4171_s5 = smov 8  }
 0xbc6   : > { %v2619_v46 = vld [vmem:[%s4170_s13 + $0x18] sm:$0xff]  ;;  %v2617_v13 = vld [vmem:[%s4170_s13 + $0x8] sm:$0xff]  ;;  %v2616_v14 = vld [vmem:[%s4170_s13] sm:$0xff] }
 0xbc7   : > { %2639 = vmatpush.msrb.mxu1 %v2619_v46  ;;  %v2781_v46 = vld [vmem:[%s4132_s6 + $0x8] sm:$0xff] }
 0xc1a   : > { %v2475_v32 = vpop.xlane.xlu1 %2474 }
 0xc1b   : > { %3255 = vrcp.f32 %v2475_v32  ;;  %v2393_v33 = vpop.xlane.xlu2 %2392  ;;  %v2487_v40 = vand.u32 2147483648, %v2475_v32  ;;  %v2485_v44 = vand.u32 2147483647, %v2475_v32  ;;  %vm2481_vm3 = vweird.f32 %v2475_v32 }
 0xc1c   : > { %3257 = vrcp.f32 %v2393_v33  ;;  %v2405_v45 = vand.u32 2147483648, %v2393_v33  ;;  %v2403_v10 = vand.u32 2147483647, %v2393_v33  ;;  %vm2399_vm7 = vweird.f32 %v2393_v33 }
 0xc1d   : > { %v2488_v49 = vor.u32 1.1754944e-38, %v2487_v40  ;;  %vm2486_vm8 = vcmp.eq.f32.partialorder %v2485_v44, 8.507059e+37 }
 0xc1e   : > { %v2406_v24 = vor.u32 1.1754944e-38, %v2405_v45  ;;  %vm2404_vm10 = vcmp.eq.f32.partialorder %v2403_v10, 8.507059e+37 }
 0xc21   : > { %v3256_v34 = vpop.eup %3255 }
 0xc22   : > { %v3258_v35 = vpop.eup %3257  ;;  %v2477_v37 = vmul.f32 %v3256_v34, %v2475_v32  ;;  %v2557_v0 = vpop.xlane.xlu0 %2556  ;;  %vm2482_vm15 = vweird.f32 %v3256_v34 }
 0xc23   : > { %v2395_v38 = vmul.f32 %v3258_v35, %v2393_v33  ;;  %3259 = vrcp.f32 %v2557_v0  ;;  %vm2400_vm2 = vweird.f32 %v3258_v35  ;;  %vm2483_vm6 = vmor %vm2481_vm3, %vm2482_vm15  ;;  %v2569_v58 = vand.u32 2147483648, %v2557_v0  ;;  %v2576_v5 = vpop.permute.xlu2 %2575  ;;  %v2683_v33 = vld [vmem:[%s4173_s4 + $0x18] sm:$0xff] }
 0xc24   : > { %v2478_v39 = vsub.f32 1.0, %v2477_v37  ;;  %vm2401_vm9 = vmor %vm2399_vm7, %vm2400_vm2  ;;  %v2567_v61 = vand.u32 2147483647, %v2557_v0  ;;  %vm2563_vm12 = vweird.f32 %v2557_v0 }
 0xc25   : > { %v2396_v41 = vsub.f32 1.0, %v2395_v38  ;;  %v2570_v63 = vor.u32 1.1754944e-38, %v2569_v58  ;;  %v3200_v58 = vld [vmem:[%s4177_s1] ss:$0 sm:$0xff]  ;;  %s3082_s1 = sshll.u32 %s3643_s0, 5 }
 0xc26   : > { %v2479_v42 = vmul.f32 %v3256_v34, %v2478_v39  ;;  %vm2568_vm15 = vcmp.eq.f32.partialorder %v2567_v61, 8.507059e+37 }
 0xc27   : > { %v2397_v7 = vmul.f32 %v3258_v35, %v2396_v41 }
 0xc28   : > { %v2480_v47 = vadd.f32 %v3256_v34, %v2479_v42 }
 0xc29   : > { %v3260_v48 = vpop.eup %3259  ;;  %v2398_v43 = vadd.f32 %v3258_v35, %v2397_v7 }
 0xc2a   : > { %v2484_v50 = vsel %vm2483_vm6, %v3256_v34, %v2480_v47  ;;  %v2559_v51 = vmul.f32 %v3260_v48, %v2557_v0  ;;  %vm2564_vm11 = vweird.f32 %v3260_v48  ;;  %v2682_v34 = vld [vmem:[%s4173_s4 + $0x10] sm:$0xff] }
 0xc2b   : > { %v2489_v53 = vsel %vm2486_vm8, %v2488_v49, %v2484_v50  ;;  %v2402_v54 = vsel %vm2401_vm9, %v3258_v35, %v2398_v43  ;;  %vm2565_vm13 = vmor %vm2563_vm12, %vm2564_vm11  ;;  %v2680_v35 = vld [vmem:[%s4173_s4] sm:$0xff] }
 0xc2c   : > { %v2407_v55 = vsel %vm2404_vm10, %v2406_v24, %v2402_v54  ;;  %v2560_v56 = vsub.f32 1.0, %v2559_v51  ;;  %v2490_v57 = vmul.f32 %v3940_v11, %v2489_v53  ;;  %v3199_v51 = vld [vmem:[%s4176_s21] ss:$0 sm:$0xff]  ;;  %s2845_s21 = sshll.u32 %s3957_s8, 4  ;;  %s2846_s21 = int_to_ptr.vmem [resolvable:$true] %s2845_s21 }
 0xc2d   : > { %v2408_v59 = vmul.f32 %v3942_v12, %v2407_v55  ;;  %v2618_v12 = vld [vmem:[%s4170_s13 + $0x10] sm:$0xff] }
 0xc2e   : > { %v2561_v60 = vmul.f32 %v3260_v48, %v2560_v56  ;;  %3065 = vst.msk [vmem:[%s3957_s8 + $0x10] sm:$0xff] %vm1274_vm1, %v2490_v57  ;;  %2640 = vmatpush.msrb.mxu1 %v2618_v12  ;;  %v2780_v12 = vld [vmem:[%s4132_s6] sm:$0xff] }
 0xc2f   : > { %3061 = vst.msk [vmem:[%s3957_s8 + $0x8] sm:$0xff] %vm1274_vm1, %v2408_v59 }
 0xc30   : > { %v2562_v62 = vadd.f32 %v3260_v48, %v2561_v60  ;;  %2641 = vmatpush.msrb.mxu1 %v2617_v13 }
 0xc32   : > { %v2566_v1 = vsel %vm2565_vm13, %v3260_v48, %v2562_v62  ;;  %v2412_v2 = vpop.permute.xlu1 %2411  ;;  %2642 = vmatpush.msrb.mxu1 %v2616_v14  ;;  %v3201_v62 = vld [vmem:[%s4178_s9] ss:$0 sm:$0xff]  ;;  %s2844_s9 = scalar_lea.hbm %s3620_s20, %s3082_s1 }
 0xc33   : > { %v2571_v3 = vsel %vm2568_vm15, %v2570_v63, %v2566_v1  ;;  %2432 = vmatpush.msrb.mxu2 %v2412_v2 }
 0xc34   : > { %3062 = vmatmul.msk.f32.vlgmr.msrb.gmra.mxu2 %vm1274_vm1, %v2408_v59  ;;  %v2572_v6 = vmul.f32 %v3948_v18, %v2571_v3 }
 0xc35   : > { %2596 = vmatpush.msra.mxu2 %v2576_v5  ;;  %v2494_v8 = vpop.permute.xlu0 %2493 }
 0xc36   : > { %2514 = vmatpush.msrb.mxu3 %v2494_v8  ;;  %3069 = vst.msk [vmem:[%s3957_s8 + $0x18] sm:$0xff] %vm1274_vm1, %v2572_v6 }
 0xc37   : > { %3066 = vmatmul.msk.f32.vlgmr.msrb.gmra.mxu3 %vm1274_vm1, %v2490_v57 }
 0xc38   : > { %2703 = vmatpush.msra.mxu3 %v2683_v33 }
 0xc3a   : > { %2704 = vmatpush.msra.mxu3 %v2682_v34 }
 0xc3c   : > { %3070 = vmatmul.msk.f32.vlgmr.msra.gmra.mxu2 %vm1274_vm1, %v2572_v6 }
 0xc3f   : > { %v2352_v9 = vpop.f32.mrf.mxu3 }
 0xcb7   : > { %v2434_v52 = vpop.f32.mrf.mxu2 }
 0xcb8   : > { %2602 = vrot.lane.b32.xlu0 %v2434_v52, %s4171_s5 }
 0xcba   : > { %v2516_v4 = vpop.f32.mrf.mxu3 }
 0xcbb   : > { %2606 = vrot.lane.b32.xlu1 %v2516_v4, %s4157_s3  ;;  %s4174_s3 = sld [smem:[#allocation35_spill]]  ;;  %v2783_v4 = vld [vmem:[%s4132_s6 + $0x18] sm:$0xff] }
 0xcbc   : > { %2803 = vmatpush.msrb.mxu2 %v2783_v4 }
 0xcbf   : > { %v2598_v11 = vpop.f32.mrf.mxu2 }
 0xcc0   : > { %2610 = vrot.lane.b32.xlu2 %v2598_v11, %s4156_s11  ;;  %s4175_s11 = sld [smem:[#allocation31_spill]]  ;;  %v2782_v11 = vld [vmem:[%s4132_s6 + $0x10] sm:$0xff] }
 0xcc1   : > { %v2719_v37 = vld [vmem:[%s4174_s3 + $0x38] sm:$0xff]  ;;  %v2718_v0 = vld [vmem:[%s4174_s3 + $0x30] sm:$0xff]  ;;  %v2717_v38 = vld [vmem:[%s4174_s3 + $0x28] sm:$0xff]  ;;  %2804 = vmatpush.msrb.mxu2 %v2782_v11 }
 0xcc2   : > { %2735 = vmatpush.msra.mxu0 %v2719_v37  ;;  %v2716_v41 = vld [vmem:[%s4174_s3 + $0x20] sm:$0xff]  ;;  %v2715_v44 = vld [vmem:[%s4174_s3 + $0x18] sm:$0xff]  ;;  %v2714_v55 = vld [vmem:[%s4174_s3 + $0x10] sm:$0xff] }
 0xcc3   : > { %v2713_v56 = vld [vmem:[%s4174_s3 + $0x8] sm:$0xff]  ;;  %v2712_v57 = vld [vmem:[%s4174_s3] sm:$0xff]  ;;  %2805 = vmatpush.msrb.mxu2 %v2781_v46  ;;  %s2847_s3 = sshll.u32 %s2844_s9, 4  ;;  %s2848_s3 = int_to_ptr.hbm [resolvable:$true] %s2847_s3 }
 0xcc4   : > { %2736 = vmatpush.msra.mxu0 %v2718_v0  ;;  %s3280_s6 = sshra.s32 %s2848_s3, 4  ;;  %s3281_s6 = int_to_ptr.hbm [resolvable:$true] %s3280_s6 }
 0xcc5   : > { %2806 = vmatpush.msrb.mxu2 %v2780_v12  ;;  %p3287_p0 = scmp.lt.s32.totalorder %s3281_s6, %s3620_s20 }
 0xcc6   : > { %2737 = vmatpush.msra.mxu0 %v2717_v38  ;;  %v3198_v43 = vld [vmem:[%s4175_s11] ss:$0 sm:$0xff]  ;;  %s4180_s11 = sld [smem:[#allocation38_spill]] }
 0xcc8   : > { %2738 = vmatpush.msra.mxu0 %v2716_v41 }
 0xcca   : > { %2739 = vmatpush.msra.mxu0 %v2715_v44 }
 0xccc   : > { %2740 = vmatpush.msra.mxu0 %v2714_v55 }
 0xcce   : > { %2741 = vmatpush.msra.mxu0 %v2713_v56 }
 0xcd0   : > { %2742 = vmatpush.msra.mxu0 %v2712_v57 }
 0xd1a   : > { %v2611_v19 = vpop.permute.xlu2 %2610 }
 0xd2a   : > { %v2603_v15 = vpop.permute.xlu0 %2602 }
 0xd2b   : > { %v2613_v17 = vsel %vm1274_vm1, %v2352_v9, %v2603_v15 }
 0xd2d   : > { %v2607_v18 = vpop.permute.xlu1 %2606 }
 0xd2e   : > { %v2614_v20 = vsel %vm1607_vm4, %v2613_v17, %v2607_v18 }
 0xd2f   : > { %v2615_v21 = vsel %vm1609_vm5, %v2614_v20, %v2611_v19 }
 0xd30   : > { %3071 = vmatmul.msk.f32.vlgmr.msrb.gmra.mxu1 %vm1247_vm0, %v2615_v21 }
 0xdad   : > { %v2644_v23 = vpop.f32.mrf.mxu1 }
 0xdae   : > { %v2645_v25 = vadd.f32 %v3197_v22, %v2644_v23  ;;  %v3202_v23 = vld [vmem:[%s4179_s14] ss:$0 sm:$0xff]  ;;  %s3282_s14 = scalar_lea.hbm %s3281_s6, 32 }
 0xdaf   : > { %p3283_p11 = scmp.ne.s32.totalorder %s3281_s6, %s3282_s14 }
 0xdb0   : > { %v2647_v26 = vadd.f32 %v2645_v25, %v3919_v36  ;;  %v2681_v36 = vld [vmem:[%s4173_s4 + $0x8] sm:$0xff]  ;;  %s2819_s4 = scalar_lea.sflag [#allocation5], %s3953_s7 }
 0xdb1   : > { %2705 = vmatpush.msra.mxu3 %v2681_v36  ;;  %p3284_p12 = pnand %p3283_p11, %p3660_p5 }
 0xdb2   : > { %v2650_v27 = vsel %vm1247_vm0, %v2647_v26, 0.0 }
 0xdb3   : > { %2651 = vadd.xlane.f32.xlu0 %v2650_v27  ;;  %2706 = vmatpush.msra.mxu3 %v2680_v35  ;;  %p3285_p13 = pneg %p3284_p12 }
 0xe26   : > { %v2652_v28 = vpop.xlane.xlu0 %2651 }
 0xe27   : > { %v2653_v29 = vmul.f32 %v2652_v28, %v3806_v16 }
 0xe29   : > { %v2654_v30 = vsub.f32 %v2647_v26, %v2653_v29 }
 0xe2b   : > { %v2655_v31 = vmul.f32 %v2654_v30, %v2654_v30 }
 0xe2d   : > { %v2656_v32 = vsel %vm1247_vm0, %v2655_v31, 0.0 }
 0xe2e   : > { %2657 = vadd.xlane.f32.xlu1 %v2656_v32 }
 0xea1   : > { %v2658_v39 = vpop.xlane.xlu1 %2657 }
 0xea2   : > { %v2659_v40 = vmul.f32 %v2658_v39, %v3806_v16 }
 0xea4   : > { %v2660_v42 = vadd.f32 1e-05, %v2659_v40 }
 0xea6   : > { %3261 = vrsqrt.f32 %v2660_v42  ;;  %vm2667_vm4 = vweird.f32 %v2660_v42 }
 0xeac   : > { %v3262_v45 = vpop.eup %3261 }
 0xead   : > { %v2662_v7 = vmul.f32 %v3262_v45, %v2660_v42  ;;  %vm2668_vm1 = vweird.f32 %v3262_v45 }
 0xeae   : > { %vm2669_vm5 = vmor %vm2667_vm4, %vm2668_vm1 }
 0xeaf   : > { %v2663_v10 = vmul.f32 %v3262_v45, %v2662_v7 }
 0xeb1   : > { %v2664_v47 = vmul.f32 0.5, %v2663_v10 }
 0xeb3   : > { %v2665_v48 = vsub.f32 1.5, %v2664_v47 }
 0xeb5   : > { %v2666_v49 = vmul.f32 %v3262_v45, %v2665_v48 }
 0xeb7   : > { %v2670_v50 = vsel %vm2669_vm5, %v3262_v45, %v2666_v49 }
 0xeb8   : > { %v2671_v24 = vmul.f32 %v2670_v50, %v2654_v30 }
 0xeba   : > { %v2675_v53 = vmul.f32 %v3198_v43, %v2671_v24 }
 0xebc   : > { %v2679_v54 = vadd.f32 %v3199_v51, %v2675_v53 }
 0xebe   : > { %3072 = vmatmul.msk.f32.vlgmr.msra.gmra.mxu3 %vm1247_vm0, %v2679_v54 }
 0xf41   : > { %v2708_v59 = vpop.f32.mrf.mxu3 }
 0xf42   : > { %v2709_v60 = vadd.f32 %v3200_v58, %v2708_v59 }
 0xf44   : > { %v2711_v61 = vmax.f32 %v2709_v60, 0.0 }
 0xf46   : > { %3073 = vmatmul.msk.f32.vlgmr.msra.gmra.mxu0 %vm1726_vm14, %v2711_v61 }
 0xfc3   : > { %v2744_v63 = vpop.f32.mrf.mxu0 }
 0xfc4   : > { %v2745_v1 = vadd.f32 %v3201_v62, %v2744_v63 }
 0xfc6   : > { %v2747_v2 = vadd.f32 %v2745_v1, %v2679_v54 }
 0xfc8   : > { %v2750_v3 = vsel %vm1247_vm0, %v2747_v2, 0.0 }
 0xfc9   : > { %2751 = vadd.xlane.f32.xlu2 %v2750_v3 }
0x103c   : > { %v2752_v5 = vpop.xlane.xlu2 %2751 }
0x103d   : > { %v2753_v6 = vmul.f32 %v2752_v5, %v3806_v16 }
0x103f   : > { %v2754_v8 = vsub.f32 %v2747_v2, %v2753_v6 }
0x1041   : > { %v2755_v9 = vmul.f32 %v2754_v8, %v2754_v8 }
0x1043   : > { %v2756_v52 = vsel %vm1247_vm0, %v2755_v9, 0.0 }
0x1044   : > { %2757 = vadd.xlane.f32.xlu0 %v2756_v52 }
0x10b7   : > { %v2758_v13 = vpop.xlane.xlu0 %2757 }
0x10b8   : > { %v2759_v14 = vmul.f32 %v2758_v13, %v3806_v16  ;;  %v3203_v16 = vld [vmem:[%s4180_s11] ss:$0 sm:$0xff]  ;;  %s3286_s11 = scalar_lea.hbm %s3620_s20, 64 }
0x10b9   : > { %p3288_p1 = scmp.lt.s32.totalorder %s3286_s11, %s3282_s14 }
0x10ba   : > { %v2760_v15 = vadd.f32 1e-05, %v2759_v14 }
0x10bb   : > { %p3289_p2 = por %p3288_p1, %p3287_p0 }
0x10bc   : > { %3263 = vrsqrt.f32 %v2760_v15  ;;  %vm2767_vm2 = vweird.f32 %v2760_v15 }
0x10bd   : > { %p3290_p3 = pnand %p3289_p2, %p3285_p13 }
0x10c2   : > { %v3264_v17 = vpop.eup %3263 }
0x10c3   : > { %v2762_v18 = vmul.f32 %v3264_v17, %v2760_v15  ;;  %vm2768_vm14 = vweird.f32 %v3264_v17 }
0x10c4   : > { %vm2769_vm3 = vmor %vm2767_vm2, %vm2768_vm14 }
0x10c5   : > { %v2763_v19 = vmul.f32 %v3264_v17, %v2762_v18 }
0x10c7   : > { %v2764_v20 = vmul.f32 0.5, %v2763_v19 }
0x10c9   : > { %v2765_v21 = vsub.f32 1.5, %v2764_v20 }
0x10cb   : > { %v2766_v22 = vmul.f32 %v3264_v17, %v2765_v21 }
0x10cd   : > { %v2770_v25 = vsel %vm2769_vm3, %v3264_v17, %v2766_v22 }
0x10ce   : > { %v2771_v26 = vmul.f32 %v2770_v25, %v2754_v8 }
0x10d0   : > { %v2775_v27 = vmul.f32 %v3202_v23, %v2771_v26 }
0x10d2   : > { %v2779_v28 = vadd.f32 %v3203_v16, %v2775_v27 }
0x10d4   : > { %3074 = vmatmul.msk.f32.vlgmr.msrb.gmra.mxu2 %vm1247_vm0, %v2779_v28 }
0x10d5   : > { %3293 = shalt.err (!%p3290_p3)
}
0x10d6   : > { %s3416_s8 = smov 128   ;;  %s3019_s1 = sshll.u32 %s3953_s7, 3  ;;  %v3204_v29 = vld [vmem:[%s3610_s24] ss:$0 sm:$0xff]  ;;  %vm2811_vm0 = vcmask 162816  }
0x10d7   : > { %3084 = dma.vmem_to_hbm [thread:$0]  (%p3660_p5), %s2846_s21, 512, %s2848_s3, %s2819_s4, %s3416_s8, %s3416_s8, %s4171_s5  }
0x10d8   : > { %s3077_s9 = sshll.u32 %s3643_s0, 3  ;;  %s1214_s6 = scalar_lea.vmem [#allocation2], %s3019_s1 }
0x10d9   : > { %s2829_s10 = scalar_lea.hbm %s3615_s12, %s3077_s9  ;;  %s2831_s14 = sshll.u32 %s1214_s6, 4  ;;  %s2832_s14 = int_to_ptr.vmem [resolvable:$true] %s2831_s14 }
0x10da   : > { %s2833_s11 = sshll.u32 %s2829_s10, 4  ;;  %s2814_s13 = scalar_lea.sflag [#allocation3], %s3953_s7  ;;  %s2834_s11 = int_to_ptr.hbm [resolvable:$true] %s2833_s11 }
0x10db   : > { %s3308_s17 = sshra.s32 %s2834_s11, 4  ;;  %s3314_s0 = scalar_lea.hbm %s3615_s12, 16  ;;  %s3309_s17 = int_to_ptr.hbm [resolvable:$true] %s3308_s17 }
0x10dc   : > { %s3310_s5 = scalar_lea.hbm %s3309_s17, 8  ;;  %p3315_p9 = scmp.lt.s32.totalorder %s3309_s17, %s3615_s12 }
0x10dd   : > { %p3311_p4 = scmp.ne.s32.totalorder %s3309_s17, %s3310_s5  ;;  %p3316_p10 = scmp.lt.s32.totalorder %s3314_s0, %s3310_s5 }
0x10df   : > { %p3312_p7 = pnand %p3311_p4, %p3660_p5  ;;  %p3317_p11 = por %p3316_p10, %p3315_p9 }
0x10e1   : > { %p3313_p8 = pneg %p3312_p7 }
0x10e3   : > { %p3318_p12 = pnand %p3317_p11, %p3313_p8 }
0x1157   : > { %v2808_v30 = vpop.f32.mrf.mxu2 }
0x1158   : > { %v2809_v31 = vadd.f32 %v3204_v29, %v2808_v30 }
0x115a   : > { %2812 = vst.msk [vmem:[%s1214_s6] sm:$0xff] %vm2811_vm0, %v2809_v31 }
0x115b   : > { %3321 = shalt.err (!%p3318_p12)
}
0x115c   : > { %3083 = dma.vmem_to_hbm [thread:$0]  (%p3660_p5), %s2832_s14, 128, %s2834_s11, %s2814_s13  }
0x115d PF: > { %p3094_p13 = scmp.ge.s32.totalorder %s3360_s28, 2  ;;  %s2862_s10 = sand.u32 1, %s3348_s22  }
0x115e   : > { %s2863_s7 = scalar_lea.sflag [#allocation3], %s2862_s10 }
0x115f   : > { %p3088_p0 = pnand %p3094_p13, %p3664_p6 }
0x1161   : > { %p3089_p1 = pneg %p3088_p0 }
0x1163   : > { %3339 = dma.done.wait (%p3089_p1), %s2863_s7, 128  }
0x1164   : > { %3341 = vsyncadd (%p3089_p1), %s2863_s7, 4294967168  ;;  %s2873_s17 = scalar_lea.sflag [#allocation5], %s2862_s10 }
0x1165   : > { %3343 = dma.done.wait (%p3089_p1), %s2873_s17, 512  }
0x1166   : > { %3345 = vsyncadd (%p3089_p1), %s2873_s17, 4294966784  ;;  %s4181_s15 = sld [smem:[#allocation40_spill]]  ;;  %p93_p5 = scmp.ge.s32.totalorder %s3647_s2, 4  }
0x1167   : > { %s4182_s22 = smov %s3352_s23  ;;  %s4183_s23 = smov %s3356_s26 }
0x1168   : > { %s4185_s28 = smov %s3647_s2  ;;  %95 = sbr.rel (!%p93_p5) target bundleno = 78 (0x4e), region = 275 }
0x116c   : > { %s4184_s26 = smov %s4181_s15 }
0x116d   :  { %2879 = vsyncpa [#allocation3], 1 }
0x116e   :  { %2881 = vsyncpa [#allocation3 + $0x1], 1 }
0x116f   :  { %2882 = vsyncpa [#allocation5], 1 }
0x1170   :  { %2884 = vsyncpa [#allocation5 + $0x1], 1 }

</bundles_post_ra>
